<compile_context>
chip_gen: v5e
topology: v5e:2x2
jax: 0.10.0
libtpu: 0.0.40
codegen_flags: <defaults>
</compile_context>

<pallas_src>
import jax
import jax.numpy as jnp
from jax.experimental import pallas as pl
from jax.experimental.pallas import tpu as pltpu


# ---------------------------------------------------------------------------
# Fused Pallas kernel: conv1+ReLU -> conv2+ReLU -> maxpool -> fc1+ReLU
#                      -> fc2 -> log_softmax
# ---------------------------------------------------------------------------

def _cnn_fused_kernel(x_ref, w1_ref, b1_ref, w2_ref, b2_ref,
                      wf1_ref, bf1_ref, wf2_ref, bf2_ref, o_ref):
    x = x_ref[...]                      # (BB, 6, 6, 3) f32, NHWC
    BB = x.shape[0]

    # ---- conv1: 3x3 valid, 3 -> 32, + ReLU.
    # In-kernel im2col: static 3x3 unroll over shifted views, 9 MXU dots
    # accumulated in registers (no HBM patch matrix).
    acc1 = None
    for kh in range(3):
        for kw in range(3):
            patch = x[:, kh:kh + 4, kw:kw + 4, :].reshape(BB * 16, 3)
            w_tap = w1_ref[(kh * 3 + kw) * 3:(kh * 3 + kw + 1) * 3, :]   # (3, 32)
            d = jnp.dot(patch, w_tap, preferred_element_type=jnp.float32)
            acc1 = d if acc1 is None else acc1 + d
    y1 = jnp.maximum(acc1 + b1_ref[...], 0.0)          # (BB*16, 32)
    y1 = y1.reshape(BB, 4, 4, 32)

    # ---- conv2: 3x3 valid, 32 -> 128, + ReLU (same 9-tap scheme).
    acc2 = None
    for kh in range(3):
        for kw in range(3):
            patch = y1[:, kh:kh + 2, kw:kw + 2, :].reshape(BB * 4, 32)
            w_tap = w2_ref[(kh * 3 + kw) * 32:(kh * 3 + kw + 1) * 32, :]  # (32, 128)
            d = jnp.dot(patch, w_tap, preferred_element_type=jnp.float32)
            acc2 = d if acc2 is None else acc2 + d
    y2 = jnp.maximum(acc2 + b2_ref[...], 0.0)          # (BB*4, 128)

    # ---- max_pool2d(2) fused epilogue: 2x2 spatial -> 1x1 per image.
    pooled = jnp.max(y2.reshape(BB, 4, 128), axis=1)   # (BB, 128)

    # dropout1 / AvgPool2d(kernel_size=1) / dropout2: identity at inference.
    # flatten: pooled spatial is 1x1 -> (BB, 128) channel-ordered (== torch view).

    # ---- fc1 + ReLU
    h = jnp.maximum(
        jnp.dot(pooled, wf1_ref[...], preferred_element_type=jnp.float32)
        + bf1_ref[...], 0.0)                            # (BB, 128)

    # ---- fc2 + log_softmax. fc2 weight is zero-padded to 128 output lanes
    # and the padded bias entries are -1e30, so the softmax over 128 lanes is
    # exactly the softmax over the real 10 classes (pad prob underflows to 0)
    # while the matmul and the output store stay lane-dense.
    logits = (jnp.dot(h, wf2_ref[...], preferred_element_type=jnp.float32)
              + bf2_ref[...])                           # (BB, 128)
    m = jnp.max(logits, axis=-1, keepdims=True)
    shifted = logits - m
    lse = jnp.log(jnp.sum(jnp.exp(shifted), axis=-1, keepdims=True))
    o_ref[...] = (shifted - lse).astype(o_ref.dtype)


# ---------------------------------------------------------------------------
# Parameters: torch-convention init + one-time kernel-layout preparation
# ---------------------------------------------------------------------------

def init_params(key):
    ks = jax.random.split(key, 8)
    scale = 0.05
    return {
        # torch-convention shapes
        "conv1_w": scale * jax.random.normal(ks[0], (32, 3, 3, 3), jnp.float32),
        "conv1_b": scale * jax.random.normal(ks[1], (32,), jnp.float32),
        "conv2_w": scale * jax.random.normal(ks[2], (128, 32, 3, 3), jnp.float32),
        "conv2_b": scale * jax.random.normal(ks[3], (128,), jnp.float32),
        "fc1_w": scale * jax.random.normal(ks[4], (128, 128), jnp.float32),
        "fc1_b": scale * jax.random.normal(ks[5], (128,), jnp.float32),
        "fc2_w": scale * jax.random.normal(ks[6], (10, 128), jnp.float32),
        "fc2_b": scale * jax.random.normal(ks[7], (10,), jnp.float32),
    }


def prepare_params(params):
    """One-time reshape/transpose of torch-layout params into kernel layout."""
    w1 = jnp.transpose(params["conv1_w"], (2, 3, 1, 0)).reshape(27, 32)
    b1 = params["conv1_b"].reshape(1, 32)
    w2 = jnp.transpose(params["conv2_w"], (2, 3, 1, 0)).reshape(288, 128)
    b2 = params["conv2_b"].reshape(1, 128)
    wf1 = jnp.transpose(params["fc1_w"])                      # (in=128, out=128)
    bf1 = params["fc1_b"].reshape(1, 128)
    # Pad fc2 from 10 to 128 output lanes: zero weights, -1e30 bias.
    wf2 = jnp.zeros((128, 128), jnp.float32).at[:, :10].set(
        jnp.transpose(params["fc2_w"]))
    bf2 = jnp.full((1, 128), -1e30, jnp.float32).at[0, :10].set(params["fc2_b"])
    return {"w1": w1, "b1": b1, "w2": w2, "b2": b2,
            "wf1": wf1, "bf1": bf1, "wf2": wf2, "bf2": bf2}


# ---------------------------------------------------------------------------
# Forward pass wrapper
# ---------------------------------------------------------------------------

_MAX_BATCH_BLOCK = 256   # multiple of 8; batch is tiled when B grows (v7x VMEM/2xTC)


@jax.jit
def cnn_forward(x_nchw, prepared):
    # NCHW -> NHWC once at the boundary.
    x = jnp.transpose(x_nchw, (0, 2, 3, 1)).astype(jnp.float32)   # (B, 6, 6, 3)
    B, H, W, Cin = x.shape
    assert (H, W, Cin) == (6, 6, 3), "fc1(128,...) implies 6x6x3 inputs"

    bb = B if B <= _MAX_BATCH_BLOCK else _MAX_BATCH_BLOCK
    grid = (pl.cdiv(B, bb),)

    # Advisory cost estimate for XLA scheduling of the fused custom call.
    flops = 2 * B * (16 * 27 * 32 + 4 * 288 * 128 + 128 * 128 + 128 * 128)
    bytes_accessed = 4 * (x.size + sum(int(v.size) for v in prepared.values())
                          + B * 128)
    cost = pl.CostEstimate(flops=flops, transcendentals=B * 129,
                           bytes_accessed=bytes_accessed)

    def _const(shape):
        # Whole-array block, resident across all grid steps (constant index).
        return pl.BlockSpec(shape, lambda i: (0,) * len(shape))

    out_padded = pl.pallas_call(
        _cnn_fused_kernel,
        out_shape=jax.ShapeDtypeStruct((B, 128), jnp.float32),
        grid=grid,
        in_specs=[
            pl.BlockSpec((bb, 6, 6, 3), lambda i: (i, 0, 0, 0)),   # x (batch-tiled)
            _const((27, 32)), _const((1, 32)),                     # conv1 w, b
            _const((288, 128)), _const((1, 128)),                  # conv2 w, b
            _const((128, 128)), _const((1, 128)),                  # fc1 w, b
            _const((128, 128)), _const((1, 128)),                  # fc2 w, b (padded)
        ],
        out_specs=pl.BlockSpec((bb, 128), lambda i: (i, 0)),
        compiler_params=pltpu.CompilerParams(
            dimension_semantics=("parallel",)),
        cost_estimate=cost,
    )(x, prepared["w1"], prepared["b1"], prepared["w2"], prepared["b2"],
      prepared["wf1"], prepared["bf1"], prepared["wf2"], prepared["bf2"])

    # Kernel stores a lane-dense (B, 128) slab; the real classes are 0..9.
    return out_padded[:, :10]


# ---------------------------------------------------------------------------
# Pure-JAX reference (correctness check only)
# ---------------------------------------------------------------------------

def cnn_forward_ref(x_nchw, params):
    x = jnp.transpose(x_nchw, (0, 2, 3, 1)).astype(jnp.float32)
    y = jax.lax.conv_general_dilated(
        x, jnp.transpose(params["conv1_w"], (2, 3, 1, 0)), (1, 1), "VALID",
        dimension_numbers=("NHWC", "HWIO", "NHWC"))
    y = jax.nn.relu(y + params["conv1_b"])
    y = jax.lax.conv_general_dilated(
        y, jnp.transpose(params["conv2_w"], (2, 3, 1, 0)), (1, 1), "VALID",
        dimension_numbers=("NHWC", "HWIO", "NHWC"))
    y = jax.nn.relu(y + params["conv2_b"])
    y = jax.lax.reduce_window(y, -jnp.inf, jax.lax.max,
                              (1, 2, 2, 1), (1, 2, 2, 1), "VALID")
    y = y.reshape(y.shape[0], -1)                      # (B, 128), spatial is 1x1
    y = jax.nn.relu(y @ params["fc1_w"].T + params["fc1_b"])
    y = y @ params["fc2_w"].T + params["fc2_b"]
    return jax.nn.log_softmax(y, axis=-1)


if __name__ == "__main__":
    key = jax.random.PRNGKey(0)
    pkey, xkey = jax.random.split(key)
    params = init_params(pkey)
    prepared = prepare_params(params)           # one-time weight preparation

    # 6x6 spatial is the only size consistent with fc1(128, ...).
    x = jax.random.normal(xkey, (2, 3, 6, 6), jnp.float32)

    out = cnn_forward(x, prepared)
    out = jax.block_until_ready(out)

    assert out.shape == (2, 10), out.shape
    # log_softmax rows should sum to ~1 in probability space.
    assert jnp.allclose(jnp.sum(jnp.exp(out), axis=1), 1.0, atol=1e-4)
    # Match the pure-JAX reference.
    ref = cnn_forward_ref(x, params)
    assert jnp.allclose(out, ref, atol=5e-3, rtol=5e-3), (
        float(jnp.max(jnp.abs(out - ref))))
    print("KERNEL_OK")
</pallas_src>

<mosaic_0001>
module attributes {stable_mosaic.version = 11 : i64} {
  func.func @_cnn_fused_kernel(%arg0: i32, %arg1: memref<2x6x6x3xf32, #tpu.memory_space<vmem>>, %arg2: memref<27x32xf32, #tpu.memory_space<vmem>>, %arg3: memref<1x32xf32, #tpu.memory_space<vmem>>, %arg4: memref<288x128xf32, #tpu.memory_space<vmem>>, %arg5: memref<1x128xf32, #tpu.memory_space<vmem>>, %arg6: memref<128x128xf32, #tpu.memory_space<vmem>>, %arg7: memref<1x128xf32, #tpu.memory_space<vmem>>, %arg8: memref<128x128xf32, #tpu.memory_space<vmem>>, %arg9: memref<1x128xf32, #tpu.memory_space<vmem>>, %arg10: memref<2x128xf32, #tpu.memory_space<vmem>>) attributes {dimension_semantics = [#tpu.dimension_semantics<parallel>], iteration_bounds = array<i64: 1>, scalar_prefetch = 0 : i64, scratch_operands = 0 : i64, tpu.core_type = #tpu.core_type<tc>, window_params = [{transform_indices = @transform_0, window_bounds = array<i64: 2, 6, 6, 3>}, {pipeline_mode = #tpu.pipeline_mode<synchronous>, transform_indices = @transform_1, window_bounds = array<i64: 27, 32>}, {pipeline_mode = #tpu.pipeline_mode<synchronous>, transform_indices = @transform_2, window_bounds = array<i64: 1, 32>}, {pipeline_mode = #tpu.pipeline_mode<synchronous>, transform_indices = @transform_3, window_bounds = array<i64: 288, 128>}, {pipeline_mode = #tpu.pipeline_mode<synchronous>, transform_indices = @transform_4, window_bounds = array<i64: 1, 128>}, {pipeline_mode = #tpu.pipeline_mode<synchronous>, transform_indices = @transform_5, window_bounds = array<i64: 128, 128>}, {pipeline_mode = #tpu.pipeline_mode<synchronous>, transform_indices = @transform_6, window_bounds = array<i64: 1, 128>}, {pipeline_mode = #tpu.pipeline_mode<synchronous>, transform_indices = @transform_7, window_bounds = array<i64: 128, 128>}, {pipeline_mode = #tpu.pipeline_mode<synchronous>, transform_indices = @transform_8, window_bounds = array<i64: 1, 128>}, {transform_indices = @transform_9, window_bounds = array<i64: 2, 128>}]} {
    %c0 = arith.constant 0 : index
    %c0_0 = arith.constant 0 : index
    %c0_1 = arith.constant 0 : index
    %c0_2 = arith.constant 0 : index
    %0 = vector.load %arg1[%c0, %c0_0, %c0_1, %c0_2] : memref<2x6x6x3xf32, #tpu.memory_space<vmem>>, vector<2x6x6x3xf32>
    %1 = vector.extract_strided_slice %0 {offsets = [0, 0, 0, 0], sizes = [2, 4, 4, 3], strides = [1, 1, 1, 1]} : vector<2x6x6x3xf32> to vector<2x4x4x3xf32>
    %2 = vector.shape_cast %1 : vector<2x4x4x3xf32> to vector<32x3xf32>
    %c0_3 = arith.constant 0 : index
    %c0_4 = arith.constant 0 : index
    %3 = vector.load %arg2[%c0_3, %c0_4] : memref<27x32xf32, #tpu.memory_space<vmem>>, vector<3x32xf32>
    %cst = arith.constant dense<0.000000e+00> : vector<32x32xf32>
    %4 = tpu.matmul %2, %3, %cst {dimension_numbers = #tpu.dot_dimension_numbers<[1], [0], [0], [1], [0, 0, 1, 1], [], []>} : vector<32x3xf32>, vector<3x32xf32>, vector<32x32xf32> -> vector<32x32xf32>
    %5 = vector.extract_strided_slice %0 {offsets = [0, 0, 1, 0], sizes = [2, 4, 4, 3], strides = [1, 1, 1, 1]} : vector<2x6x6x3xf32> to vector<2x4x4x3xf32>
    %6 = vector.shape_cast %5 : vector<2x4x4x3xf32> to vector<32x3xf32>
    %c3 = arith.constant 3 : index
    %c0_5 = arith.constant 0 : index
    %7 = vector.load %arg2[%c3, %c0_5] : memref<27x32xf32, #tpu.memory_space<vmem>>, vector<3x32xf32>
    %cst_6 = arith.constant dense<0.000000e+00> : vector<32x32xf32>
    %8 = tpu.matmul %6, %7, %cst_6 {dimension_numbers = #tpu.dot_dimension_numbers<[1], [0], [0], [1], [0, 0, 1, 1], [], []>} : vector<32x3xf32>, vector<3x32xf32>, vector<32x32xf32> -> vector<32x32xf32>
    %9 = arith.addf %4, %8 : vector<32x32xf32>
    %10 = vector.extract_strided_slice %0 {offsets = [0, 0, 2, 0], sizes = [2, 4, 4, 3], strides = [1, 1, 1, 1]} : vector<2x6x6x3xf32> to vector<2x4x4x3xf32>
    %11 = vector.shape_cast %10 : vector<2x4x4x3xf32> to vector<32x3xf32>
    %c6 = arith.constant 6 : index
    %c0_7 = arith.constant 0 : index
    %12 = vector.load %arg2[%c6, %c0_7] : memref<27x32xf32, #tpu.memory_space<vmem>>, vector<3x32xf32>
    %cst_8 = arith.constant dense<0.000000e+00> : vector<32x32xf32>
    %13 = tpu.matmul %11, %12, %cst_8 {dimension_numbers = #tpu.dot_dimension_numbers<[1], [0], [0], [1], [0, 0, 1, 1], [], []>} : vector<32x3xf32>, vector<3x32xf32>, vector<32x32xf32> -> vector<32x32xf32>
    %14 = arith.addf %9, %13 : vector<32x32xf32>
    %15 = vector.extract_strided_slice %0 {offsets = [0, 1, 0, 0], sizes = [2, 4, 4, 3], strides = [1, 1, 1, 1]} : vector<2x6x6x3xf32> to vector<2x4x4x3xf32>
    %16 = vector.shape_cast %15 : vector<2x4x4x3xf32> to vector<32x3xf32>
    %c9 = arith.constant 9 : index
    %c0_9 = arith.constant 0 : index
    %17 = vector.load %arg2[%c9, %c0_9] : memref<27x32xf32, #tpu.memory_space<vmem>>, vector<3x32xf32>
    %cst_10 = arith.constant dense<0.000000e+00> : vector<32x32xf32>
    %18 = tpu.matmul %16, %17, %cst_10 {dimension_numbers = #tpu.dot_dimension_numbers<[1], [0], [0], [1], [0, 0, 1, 1], [], []>} : vector<32x3xf32>, vector<3x32xf32>, vector<32x32xf32> -> vector<32x32xf32>
    %19 = arith.addf %14, %18 : vector<32x32xf32>
    %20 = vector.extract_strided_slice %0 {offsets = [0, 1, 1, 0], sizes = [2, 4, 4, 3], strides = [1, 1, 1, 1]} : vector<2x6x6x3xf32> to vector<2x4x4x3xf32>
    %21 = vector.shape_cast %20 : vector<2x4x4x3xf32> to vector<32x3xf32>
    %c12 = arith.constant 12 : index
    %c0_11 = arith.constant 0 : index
    %22 = vector.load %arg2[%c12, %c0_11] : memref<27x32xf32, #tpu.memory_space<vmem>>, vector<3x32xf32>
    %cst_12 = arith.constant dense<0.000000e+00> : vector<32x32xf32>
    %23 = tpu.matmul %21, %22, %cst_12 {dimension_numbers = #tpu.dot_dimension_numbers<[1], [0], [0], [1], [0, 0, 1, 1], [], []>} : vector<32x3xf32>, vector<3x32xf32>, vector<32x32xf32> -> vector<32x32xf32>
    %24 = arith.addf %19, %23 : vector<32x32xf32>
    %25 = vector.extract_strided_slice %0 {offsets = [0, 1, 2, 0], sizes = [2, 4, 4, 3], strides = [1, 1, 1, 1]} : vector<2x6x6x3xf32> to vector<2x4x4x3xf32>
    %26 = vector.shape_cast %25 : vector<2x4x4x3xf32> to vector<32x3xf32>
    %c15 = arith.constant 15 : index
    %c0_13 = arith.constant 0 : index
    %27 = vector.load %arg2[%c15, %c0_13] : memref<27x32xf32, #tpu.memory_space<vmem>>, vector<3x32xf32>
    %cst_14 = arith.constant dense<0.000000e+00> : vector<32x32xf32>
    %28 = tpu.matmul %26, %27, %cst_14 {dimension_numbers = #tpu.dot_dimension_numbers<[1], [0], [0], [1], [0, 0, 1, 1], [], []>} : vector<32x3xf32>, vector<3x32xf32>, vector<32x32xf32> -> vector<32x32xf32>
    %29 = arith.addf %24, %28 : vector<32x32xf32>
    %30 = vector.extract_strided_slice %0 {offsets = [0, 2, 0, 0], sizes = [2, 4, 4, 3], strides = [1, 1, 1, 1]} : vector<2x6x6x3xf32> to vector<2x4x4x3xf32>
    %31 = vector.shape_cast %30 : vector<2x4x4x3xf32> to vector<32x3xf32>
    %c18 = arith.constant 18 : index
    %c0_15 = arith.constant 0 : index
    %32 = vector.load %arg2[%c18, %c0_15] : memref<27x32xf32, #tpu.memory_space<vmem>>, vector<3x32xf32>
    %cst_16 = arith.constant dense<0.000000e+00> : vector<32x32xf32>
    %33 = tpu.matmul %31, %32, %cst_16 {dimension_numbers = #tpu.dot_dimension_numbers<[1], [0], [0], [1], [0, 0, 1, 1], [], []>} : vector<32x3xf32>, vector<3x32xf32>, vector<32x32xf32> -> vector<32x32xf32>
    %34 = arith.addf %29, %33 : vector<32x32xf32>
    %35 = vector.extract_strided_slice %0 {offsets = [0, 2, 1, 0], sizes = [2, 4, 4, 3], strides = [1, 1, 1, 1]} : vector<2x6x6x3xf32> to vector<2x4x4x3xf32>
    %36 = vector.shape_cast %35 : vector<2x4x4x3xf32> to vector<32x3xf32>
    %c21 = arith.constant 21 : index
    %c0_17 = arith.constant 0 : index
    %37 = vector.load %arg2[%c21, %c0_17] : memref<27x32xf32, #tpu.memory_space<vmem>>, vector<3x32xf32>
    %cst_18 = arith.constant dense<0.000000e+00> : vector<32x32xf32>
    %38 = tpu.matmul %36, %37, %cst_18 {dimension_numbers = #tpu.dot_dimension_numbers<[1], [0], [0], [1], [0, 0, 1, 1], [], []>} : vector<32x3xf32>, vector<3x32xf32>, vector<32x32xf32> -> vector<32x32xf32>
    %39 = arith.addf %34, %38 : vector<32x32xf32>
    %40 = vector.extract_strided_slice %0 {offsets = [0, 2, 2, 0], sizes = [2, 4, 4, 3], strides = [1, 1, 1, 1]} : vector<2x6x6x3xf32> to vector<2x4x4x3xf32>
    %41 = vector.shape_cast %40 : vector<2x4x4x3xf32> to vector<32x3xf32>
    %c24 = arith.constant 24 : index
    %c0_19 = arith.constant 0 : index
    %42 = vector.load %arg2[%c24, %c0_19] : memref<27x32xf32, #tpu.memory_space<vmem>>, vector<3x32xf32>
    %cst_20 = arith.constant dense<0.000000e+00> : vector<32x32xf32>
    %43 = tpu.matmul %41, %42, %cst_20 {dimension_numbers = #tpu.dot_dimension_numbers<[1], [0], [0], [1], [0, 0, 1, 1], [], []>} : vector<32x3xf32>, vector<3x32xf32>, vector<32x32xf32> -> vector<32x32xf32>
    %44 = arith.addf %39, %43 : vector<32x32xf32>
    %c0_21 = arith.constant 0 : index
    %c0_22 = arith.constant 0 : index
    %45 = vector.load %arg3[%c0_21, %c0_22] : memref<1x32xf32, #tpu.memory_space<vmem>>, vector<1x32xf32>
    %46 = vector.broadcast %45 : vector<1x32xf32> to vector<32x32xf32>
    %47 = arith.addf %44, %46 : vector<32x32xf32>
    %cst_23 = arith.constant 0.000000e+00 : f32
    %48 = vector.broadcast %cst_23 : f32 to vector<32x32xf32>
    %49 = arith.maximumf %47, %48 : vector<32x32xf32>
    %50 = vector.shape_cast %49 : vector<32x32xf32> to vector<2x4x4x32xf32>
    %51 = vector.extract_strided_slice %50 {offsets = [0, 0, 0, 0], sizes = [2, 2, 2, 32], strides = [1, 1, 1, 1]} : vector<2x4x4x32xf32> to vector<2x2x2x32xf32>
    %52 = vector.shape_cast %51 : vector<2x2x2x32xf32> to vector<8x32xf32>
    %c0_24 = arith.constant 0 : index
    %c0_25 = arith.constant 0 : index
    %53 = vector.load %arg4[%c0_24, %c0_25] : memref<288x128xf32, #tpu.memory_space<vmem>>, vector<32x128xf32>
    %cst_26 = arith.constant dense<0.000000e+00> : vector<8x128xf32>
    %54 = tpu.matmul %52, %53, %cst_26 {dimension_numbers = #tpu.dot_dimension_numbers<[1], [0], [0], [1], [0, 0, 1, 1], [], []>} : vector<8x32xf32>, vector<32x128xf32>, vector<8x128xf32> -> vector<8x128xf32>
    %55 = vector.extract_strided_slice %50 {offsets = [0, 0, 1, 0], sizes = [2, 2, 2, 32], strides = [1, 1, 1, 1]} : vector<2x4x4x32xf32> to vector<2x2x2x32xf32>
    %56 = vector.shape_cast %55 : vector<2x2x2x32xf32> to vector<8x32xf32>
    %c32 = arith.constant 32 : index
    %c0_27 = arith.constant 0 : index
    %57 = vector.load %arg4[%c32, %c0_27] : memref<288x128xf32, #tpu.memory_space<vmem>>, vector<32x128xf32>
    %cst_28 = arith.constant dense<0.000000e+00> : vector<8x128xf32>
    %58 = tpu.matmul %56, %57, %cst_28 {dimension_numbers = #tpu.dot_dimension_numbers<[1], [0], [0], [1], [0, 0, 1, 1], [], []>} : vector<8x32xf32>, vector<32x128xf32>, vector<8x128xf32> -> vector<8x128xf32>
    %59 = arith.addf %54, %58 : vector<8x128xf32>
    %60 = vector.extract_strided_slice %50 {offsets = [0, 0, 2, 0], sizes = [2, 2, 2, 32], strides = [1, 1, 1, 1]} : vector<2x4x4x32xf32> to vector<2x2x2x32xf32>
    %61 = vector.shape_cast %60 : vector<2x2x2x32xf32> to vector<8x32xf32>
    %c64 = arith.constant 64 : index
    %c0_29 = arith.constant 0 : index
    %62 = vector.load %arg4[%c64, %c0_29] : memref<288x128xf32, #tpu.memory_space<vmem>>, vector<32x128xf32>
    %cst_30 = arith.constant dense<0.000000e+00> : vector<8x128xf32>
    %63 = tpu.matmul %61, %62, %cst_30 {dimension_numbers = #tpu.dot_dimension_numbers<[1], [0], [0], [1], [0, 0, 1, 1], [], []>} : vector<8x32xf32>, vector<32x128xf32>, vector<8x128xf32> -> vector<8x128xf32>
    %64 = arith.addf %59, %63 : vector<8x128xf32>
    %65 = vector.extract_strided_slice %50 {offsets = [0, 1, 0, 0], sizes = [2, 2, 2, 32], strides = [1, 1, 1, 1]} : vector<2x4x4x32xf32> to vector<2x2x2x32xf32>
    %66 = vector.shape_cast %65 : vector<2x2x2x32xf32> to vector<8x32xf32>
    %c96 = arith.constant 96 : index
    %c0_31 = arith.constant 0 : index
    %67 = vector.load %arg4[%c96, %c0_31] : memref<288x128xf32, #tpu.memory_space<vmem>>, vector<32x128xf32>
    %cst_32 = arith.constant dense<0.000000e+00> : vector<8x128xf32>
    %68 = tpu.matmul %66, %67, %cst_32 {dimension_numbers = #tpu.dot_dimension_numbers<[1], [0], [0], [1], [0, 0, 1, 1], [], []>} : vector<8x32xf32>, vector<32x128xf32>, vector<8x128xf32> -> vector<8x128xf32>
    %69 = arith.addf %64, %68 : vector<8x128xf32>
    %70 = vector.extract_strided_slice %50 {offsets = [0, 1, 1, 0], sizes = [2, 2, 2, 32], strides = [1, 1, 1, 1]} : vector<2x4x4x32xf32> to vector<2x2x2x32xf32>
    %71 = vector.shape_cast %70 : vector<2x2x2x32xf32> to vector<8x32xf32>
    %c128 = arith.constant 128 : index
    %c0_33 = arith.constant 0 : index
    %72 = vector.load %arg4[%c128, %c0_33] : memref<288x128xf32, #tpu.memory_space<vmem>>, vector<32x128xf32>
    %cst_34 = arith.constant dense<0.000000e+00> : vector<8x128xf32>
    %73 = tpu.matmul %71, %72, %cst_34 {dimension_numbers = #tpu.dot_dimension_numbers<[1], [0], [0], [1], [0, 0, 1, 1], [], []>} : vector<8x32xf32>, vector<32x128xf32>, vector<8x128xf32> -> vector<8x128xf32>
    %74 = arith.addf %69, %73 : vector<8x128xf32>
    %75 = vector.extract_strided_slice %50 {offsets = [0, 1, 2, 0], sizes = [2, 2, 2, 32], strides = [1, 1, 1, 1]} : vector<2x4x4x32xf32> to vector<2x2x2x32xf32>
    %76 = vector.shape_cast %75 : vector<2x2x2x32xf32> to vector<8x32xf32>
    %c160 = arith.constant 160 : index
    %c0_35 = arith.constant 0 : index
    %77 = vector.load %arg4[%c160, %c0_35] : memref<288x128xf32, #tpu.memory_space<vmem>>, vector<32x128xf32>
    %cst_36 = arith.constant dense<0.000000e+00> : vector<8x128xf32>
    %78 = tpu.matmul %76, %77, %cst_36 {dimension_numbers = #tpu.dot_dimension_numbers<[1], [0], [0], [1], [0, 0, 1, 1], [], []>} : vector<8x32xf32>, vector<32x128xf32>, vector<8x128xf32> -> vector<8x128xf32>
    %79 = arith.addf %74, %78 : vector<8x128xf32>
    %80 = vector.extract_strided_slice %50 {offsets = [0, 2, 0, 0], sizes = [2, 2, 2, 32], strides = [1, 1, 1, 1]} : vector<2x4x4x32xf32> to vector<2x2x2x32xf32>
    %81 = vector.shape_cast %80 : vector<2x2x2x32xf32> to vector<8x32xf32>
    %c192 = arith.constant 192 : index
    %c0_37 = arith.constant 0 : index
    %82 = vector.load %arg4[%c192, %c0_37] : memref<288x128xf32, #tpu.memory_space<vmem>>, vector<32x128xf32>
    %cst_38 = arith.constant dense<0.000000e+00> : vector<8x128xf32>
    %83 = tpu.matmul %81, %82, %cst_38 {dimension_numbers = #tpu.dot_dimension_numbers<[1], [0], [0], [1], [0, 0, 1, 1], [], []>} : vector<8x32xf32>, vector<32x128xf32>, vector<8x128xf32> -> vector<8x128xf32>
    %84 = arith.addf %79, %83 : vector<8x128xf32>
    %85 = vector.extract_strided_slice %50 {offsets = [0, 2, 1, 0], sizes = [2, 2, 2, 32], strides = [1, 1, 1, 1]} : vector<2x4x4x32xf32> to vector<2x2x2x32xf32>
    %86 = vector.shape_cast %85 : vector<2x2x2x32xf32> to vector<8x32xf32>
    %c224 = arith.constant 224 : index
    %c0_39 = arith.constant 0 : index
    %87 = vector.load %arg4[%c224, %c0_39] : memref<288x128xf32, #tpu.memory_space<vmem>>, vector<32x128xf32>
    %cst_40 = arith.constant dense<0.000000e+00> : vector<8x128xf32>
    %88 = tpu.matmul %86, %87, %cst_40 {dimension_numbers = #tpu.dot_dimension_numbers<[1], [0], [0], [1], [0, 0, 1, 1], [], []>} : vector<8x32xf32>, vector<32x128xf32>, vector<8x128xf32> -> vector<8x128xf32>
    %89 = arith.addf %84, %88 : vector<8x128xf32>
    %90 = vector.extract_strided_slice %50 {offsets = [0, 2, 2, 0], sizes = [2, 2, 2, 32], strides = [1, 1, 1, 1]} : vector<2x4x4x32xf32> to vector<2x2x2x32xf32>
    %91 = vector.shape_cast %90 : vector<2x2x2x32xf32> to vector<8x32xf32>
    %c256 = arith.constant 256 : index
    %c0_41 = arith.constant 0 : index
    %92 = vector.load %arg4[%c256, %c0_41] : memref<288x128xf32, #tpu.memory_space<vmem>>, vector<32x128xf32>
    %cst_42 = arith.constant dense<0.000000e+00> : vector<8x128xf32>
    %93 = tpu.matmul %91, %92, %cst_42 {dimension_numbers = #tpu.dot_dimension_numbers<[1], [0], [0], [1], [0, 0, 1, 1], [], []>} : vector<8x32xf32>, vector<32x128xf32>, vector<8x128xf32> -> vector<8x128xf32>
    %94 = arith.addf %89, %93 : vector<8x128xf32>
    %c0_43 = arith.constant 0 : index
    %c0_44 = arith.constant 0 : index
    %95 = vector.load %arg5[%c0_43, %c0_44] : memref<1x128xf32, #tpu.memory_space<vmem>>, vector<1x128xf32>
    %96 = vector.broadcast %95 : vector<1x128xf32> to vector<8x128xf32>
    %97 = arith.addf %94, %96 : vector<8x128xf32>
    %cst_45 = arith.constant 0.000000e+00 : f32
    %98 = vector.broadcast %cst_45 : f32 to vector<8x128xf32>
    %99 = arith.maximumf %97, %98 : vector<8x128xf32>
    %100 = vector.shape_cast %99 : vector<8x128xf32> to vector<2x4x128xf32>
    %cst_46 = arith.constant dense<0xFF800000> : vector<2x128xf32>
    %101 = vector.multi_reduction <maximumf>, %100, %cst_46 [1] : vector<2x4x128xf32> to vector<2x128xf32>
    %c0_47 = arith.constant 0 : index
    %c0_48 = arith.constant 0 : index
    %102 = vector.load %arg6[%c0_47, %c0_48] : memref<128x128xf32, #tpu.memory_space<vmem>>, vector<128x128xf32>
    %cst_49 = arith.constant dense<0.000000e+00> : vector<2x128xf32>
    %103 = tpu.matmul %101, %102, %cst_49 {dimension_numbers = #tpu.dot_dimension_numbers<[1], [0], [0], [1], [0, 0, 1, 1], [], []>} : vector<2x128xf32>, vector<128x128xf32>, vector<2x128xf32> -> vector<2x128xf32>
    %c0_50 = arith.constant 0 : index
    %c0_51 = arith.constant 0 : index
    %104 = vector.load %arg7[%c0_50, %c0_51] : memref<1x128xf32, #tpu.memory_space<vmem>>, vector<1x128xf32>
    %105 = vector.broadcast %104 : vector<1x128xf32> to vector<2x128xf32>
    %106 = arith.addf %103, %105 : vector<2x128xf32>
    %cst_52 = arith.constant 0.000000e+00 : f32
    %107 = vector.broadcast %cst_52 : f32 to vector<2x128xf32>
    %108 = arith.maximumf %106, %107 : vector<2x128xf32>
    %c0_53 = arith.constant 0 : index
    %c0_54 = arith.constant 0 : index
    %109 = vector.load %arg8[%c0_53, %c0_54] : memref<128x128xf32, #tpu.memory_space<vmem>>, vector<128x128xf32>
    %cst_55 = arith.constant dense<0.000000e+00> : vector<2x128xf32>
    %110 = tpu.matmul %108, %109, %cst_55 {dimension_numbers = #tpu.dot_dimension_numbers<[1], [0], [0], [1], [0, 0, 1, 1], [], []>} : vector<2x128xf32>, vector<128x128xf32>, vector<2x128xf32> -> vector<2x128xf32>
    %c0_56 = arith.constant 0 : index
    %c0_57 = arith.constant 0 : index
    %111 = vector.load %arg9[%c0_56, %c0_57] : memref<1x128xf32, #tpu.memory_space<vmem>>, vector<1x128xf32>
    %112 = vector.broadcast %111 : vector<1x128xf32> to vector<2x128xf32>
    %113 = arith.addf %110, %112 : vector<2x128xf32>
    %cst_58 = arith.constant dense<0xFF800000> : vector<2xf32>
    %114 = vector.multi_reduction <maximumf>, %113, %cst_58 [1] : vector<2x128xf32> to vector<2xf32>
    %115 = vector.shape_cast %114 : vector<2xf32> to vector<2x1xf32>
    %116 = vector.broadcast %115 : vector<2x1xf32> to vector<2x128xf32>
    %117 = arith.subf %113, %116 : vector<2x128xf32>
    %118 = math.exp %117 : vector<2x128xf32>
    %cst_59 = arith.constant dense<0.000000e+00> : vector<2xf32>
    %119 = vector.multi_reduction <add>, %118, %cst_59 [1] : vector<2x128xf32> to vector<2xf32>
    %120 = vector.shape_cast %119 : vector<2xf32> to vector<2x1xf32>
    %121 = math.log %120 : vector<2x1xf32>
    %122 = vector.broadcast %121 : vector<2x1xf32> to vector<2x128xf32>
    %123 = arith.subf %117, %122 : vector<2x128xf32>
    %c0_60 = arith.constant 0 : index
    %c0_61 = arith.constant 0 : index
    %124 = vector.load %arg10[%c0_60, %c0_61] : memref<2x128xf32, #tpu.memory_space<vmem>>, vector<2x128xf32>
    tpu.vector_store %arg10[%c0_60, %c0_61], %123 {strides = array<i32>} : memref<2x128xf32, #tpu.memory_space<vmem>>, vector<2x128xf32>,
    return
  }
  func.func @transform_0(%arg0: i32) -> (i32, i32, i32, i32) {
    %c0_i32 = arith.constant 0 : i32
    %c0_i32_0 = arith.constant 0 : i32
    %c0_i32_1 = arith.constant 0 : i32
    %c0_i32_2 = arith.constant 0 : i32
    return %arg0, %c0_i32, %c0_i32_0, %c0_i32_1 : i32, i32, i32, i32
  }
  func.func @transform_1(%arg0: i32) -> (i32, i32) {
    %c0_i32 = arith.constant 0 : i32
    %c0_i32_0 = arith.constant 0 : i32
    %c0_i32_1 = arith.constant 0 : i32
    return %c0_i32, %c0_i32_0 : i32, i32
  }
  func.func @transform_2(%arg0: i32) -> (i32, i32) {
    %c0_i32 = arith.constant 0 : i32
    %c0_i32_0 = arith.constant 0 : i32
    %c0_i32_1 = arith.constant 0 : i32
    return %c0_i32, %c0_i32_0 : i32, i32
  }
  func.func @transform_3(%arg0: i32) -> (i32, i32) {
    %c0_i32 = arith.constant 0 : i32
    %c0_i32_0 = arith.constant 0 : i32
    %c0_i32_1 = arith.constant 0 : i32
    return %c0_i32, %c0_i32_0 : i32, i32
  }
  func.func @transform_4(%arg0: i32) -> (i32, i32) {
    %c0_i32 = arith.constant 0 : i32
    %c0_i32_0 = arith.constant 0 : i32
    %c0_i32_1 = arith.constant 0 : i32
    return %c0_i32, %c0_i32_0 : i32, i32
  }
  func.func @transform_5(%arg0: i32) -> (i32, i32) {
    %c0_i32 = arith.constant 0 : i32
    %c0_i32_0 = arith.constant 0 : i32
    %c0_i32_1 = arith.constant 0 : i32
    return %c0_i32, %c0_i32_0 : i32, i32
  }
  func.func @transform_6(%arg0: i32) -> (i32, i32) {
    %c0_i32 = arith.constant 0 : i32
    %c0_i32_0 = arith.constant 0 : i32
    %c0_i32_1 = arith.constant 0 : i32
    return %c0_i32, %c0_i32_0 : i32, i32
  }
  func.func @transform_7(%arg0: i32) -> (i32, i32) {
    %c0_i32 = arith.constant 0 : i32
    %c0_i32_0 = arith.constant 0 : i32
    %c0_i32_1 = arith.constant 0 : i32
    return %c0_i32, %c0_i32_0 : i32, i32
  }
  func.func @transform_8(%arg0: i32) -> (i32, i32) {
    %c0_i32 = arith.constant 0 : i32
    %c0_i32_0 = arith.constant 0 : i32
    %c0_i32_1 = arith.constant 0 : i32
    return %c0_i32, %c0_i32_0 : i32, i32
  }
  func.func @transform_9(%arg0: i32) -> (i32, i32) {
    %c0_i32 = arith.constant 0 : i32
    %c0_i32_0 = arith.constant 0 : i32
    return %arg0, %c0_i32 : i32, i32
  }
}

</mosaic_0001>

<bundles_post_ra>
// kernel: cnn_forward.1
= control target key start
LH: loop header
LB: loop body
LE: loop exit
PB: predicated region body
PF: predicated region fallthrough
CT: control target
= control target key end

     0   :  { %14 = vsyncpa [#allocation3], 0  ;;  %s2172_s0 = inlined_call_operand.vmem [shape: f32[2,6,6,3], index: 0, kind: input, shape index: {}]   ;;  %s2173_s1 = inlined_call_operand.hbm [shape: f32[27,32], index: 1, kind: input, shape index: {}]   ;;  %s2174_s2 = inlined_call_operand.vmem [shape: f32[1,32], index: 2, kind: input, shape index: {}]   ;;  %s2175_s3 = inlined_call_operand.hbm [shape: f32[288,128], index: 3, kind: input, shape index: {}]   ;;  %s2176_s4 = inlined_call_operand.vmem [shape: f32[1,128], index: 4, kind: input, shape index: {}]   ;;  %s2177_s5 = inlined_call_operand.vmem [shape: f32[128,128], index: 5, kind: input, shape index: {}]   ;;  %s2178_s6 = inlined_call_operand.vmem [shape: f32[1,128], index: 6, kind: input, shape index: {}]   ;;  %s2179_s7 = inlined_call_operand.hbm [shape: f32[128,128], index: 7, kind: input, shape index: {}]   ;;  %s2180_s8 = inlined_call_operand.vmem [shape: f32[1,128], index: 8, kind: input, shape index: {}]   ;;  %s2181_s9 = inlined_call_operand.hbm [shape: f32[2,128], index: 9, kind: output, shape index: {}]  }
   0x1   :  { %15 = vsyncpa [#allocation6], 0 }
   0x2   :  { %16 = vsyncpa [#allocation4], 0  ;;  %s38_s11 = sshll.u32 %s2175_s3, 4  ;;  %s1581_s12 = smov [#allocation5]   ;;  %s39_s11 = int_to_ptr.hbm [resolvable:$true] %s38_s11 }
   0x3   :  { %s40_s13 = sshll.u32 %s1581_s12, 4  ;;  %s23_s16 = sshll.u32 %s2173_s1, 4  ;;  %s41_s13 = int_to_ptr.vmem [resolvable:$true] %s40_s13  ;;  %s24_s16 = int_to_ptr.hbm [resolvable:$true] %s23_s16 }
   0x4   :  { %s1582_s17 = smov 128   ;;  %s1583_s18 = smov 8  }
   0x5   :  { %46 = dma.hbm_to_vmem [thread:$0]  %s39_s11, 4608, %s41_s13, [#allocation6], %s1582_s17, %s1582_s17, %s1583_s18  }
   0x6   :  { %s1584_s19 = smov [#allocation2]   ;;  %s57_s23 = sshll.u32 %s2179_s7, 4  ;;  %s58_s23 = int_to_ptr.hbm [resolvable:$true] %s57_s23 }
   0x7   :  { %s25_s20 = sshll.u32 %s1584_s19, 4  ;;  %s1585_s3 = smov [#allocation7]   ;;  %s26_s20 = int_to_ptr.vmem [resolvable:$true] %s25_s20 }
   0x8   :  { %31 = dma.hbm_to_vmem [thread:$0]  %s24_s16, 512, %s26_s20, [#allocation3], %s1582_s17, %s1582_s17, %s1583_s18  }
   0x9   :  { %s59_s24 = sshll.u32 %s1585_s3, 4  ;;  %s60_s24 = int_to_ptr.vmem [resolvable:$true] %s59_s24 }
   0xa   :  { %65 = dma.hbm_to_vmem [thread:$0]  %s58_s23, 2048, %s60_s24, [#allocation6], %s1582_s17, %s1582_s17, %s1583_s18  }
   0xb   :  { %1575 = dma.done.wait [#allocation3], 512  }
   0xc   :  { %1576 = vsyncadd [#allocation3], 4294966784 }
   0xd   :  { %1577 = dma.done.wait [#allocation6], 6656  }
   0xe   :  { %1578 = vsyncadd [#allocation6], 4294960640  ;;  %v1649_v0 = vld [vmem:[%s2172_s0] sm:$0x3f]  ;;  %v1654_v1 = vld [vmem:[%s2172_s0 + $0x8] sm:$0x3f] }
   0xf   :  { %v1659_v2 = vld [vmem:[%s2172_s0 + $0x10] sm:$0x3f]  ;;  %v1664_v3 = vld [vmem:[%s2172_s0 + $0x18] sm:$0x3f]  ;;  %vm109_vm0 = vcmask 1042432   ;;  %vm110_vm1 = vcmask 1046532  }
  0x10   :  { %v1669_v4 = vld [vmem:[%s2172_s0 + $0x30] sm:$0x3f]  ;;  %v1674_v5 = vld [vmem:[%s2172_s0 + $0x38] sm:$0x3f]  ;;  %v1679_v6 = vld [vmem:[%s2172_s0 + $0x40] sm:$0x3f] }
  0x11   :  { %v1684_v7 = vld [vmem:[%s2172_s0 + $0x48] sm:$0x3f]  ;;  %v101_v8 = vrot.slane %v1649_v0, 4  ;;  %v102_v9 = vrot.slane %v1654_v1, 4  ;;  %v103_v10 = vrot.slane %v1659_v2, 4  ;;  %v104_v11 = vrot.slane %v1664_v3, 4  ;;  %vm1695_vm2 = vmor %vm109_vm0, %vm110_vm1 }
  0x12   :  { %v144_v12 = vld [vmem:[#allocation2 + $0x3] sm:$0x7]  ;;  %v105_v13 = vrot.slane %v1669_v4, 4  ;;  %v106_v14 = vrot.slane %v1674_v5, 4  ;;  %v107_v15 = vrot.slane %v1679_v6, 4  ;;  %v108_v16 = vrot.slane %v1684_v7, 4 }
  0x13   :  { %1378 = vmatpush.msk.msra.mxu0 %vm109_vm0, %v144_v12  ;;  %v92_v18 = vld [vmem:[#allocation2] sm:$0x7]  ;;  %v1370_v19 = vrot.slane %v1649_v0, 9  ;;  %v114_v20 = vrot.slane %v101_v8, 5  ;;  %v1371_v21 = vrot.slane %v1654_v1, 9  ;;  %v118_v22 = vrot.slane %v102_v9, 5 }
  0x14   :  { %1383 = vmatpush.msk.msra.mxu1 %vm109_vm0, %v92_v18  ;;  %1464 = vmatpush.msk.msra.mxu2 %vm109_vm0, %v92_v18  ;;  %v1372_v23 = vrot.slane %v1659_v2, 9  ;;  %v122_v24 = vrot.slane %v103_v10, 5  ;;  %v1373_v25 = vrot.slane %v1664_v3, 9  ;;  %v126_v26 = vrot.slane %v104_v11, 5  ;;  %v439_v27 = vld [vmem:[#allocation2 + $0xc] sm:$0x7] }
  0x15   :  { %v115_v28 = vsel %vm1695_vm2, %v1370_v19, %v114_v20  ;;  %v1718_v29 = vsel %vm1695_vm2, %v1371_v21, %v118_v22  ;;  %v1374_v30 = vrot.slane %v1669_v4, 9  ;;  %v130_v31 = vrot.slane %v105_v13, 5  ;;  %1408 = vmatpush.msk.msrb.mxu0 %vm109_vm0, %v439_v27  ;;  %v299_v32 = vld [vmem:[#allocation2 + $0x6] sm:$0x7]  ;;  %v363_v45 = vld [vmem:[#allocation2 + $0x9] sm:$0x7] }
  0x16   :  { %v1726_v33 = vsel %vm1695_vm2, %v1372_v23, %v122_v24  ;;  %v1730_v34 = vsel %vm1695_vm2, %v1373_v25, %v126_v26  ;;  %v1375_v35 = vrot.slane %v1674_v5, 9  ;;  %v134_v36 = vrot.slane %v106_v14, 5  ;;  %145 = vst [vmem:[#allocation1] ss:$2 sm:$0xff] %v115_v28  ;;  %1396 = vmatpush.msk.msrb.mxu2 %vm109_vm0, %v299_v32  ;;  %1401 = vmatpush.msk.msra.mxu3 %vm109_vm0, %v363_v45  ;;  %v651_v47 = vld [vmem:[#allocation2 + $0x15] sm:$0x7] }
  0x17   :  { %v131_v37 = vsel %vm1695_vm2, %v1374_v30, %v130_v31  ;;  %v1376_v38 = vrot.slane %v1679_v6, 9  ;;  %v138_v39 = vrot.slane %v107_v15, 5  ;;  %v1377_v40 = vrot.slane %v1684_v7, 9  ;;  %147 = vst [vmem:[#allocation1 + $0x1] ss:$2 sm:$0xff] %v1718_v29  ;;  %s1359_s14 = sshll.u32 %s2181_s9, 4  ;;  %s1360_s14 = int_to_ptr.hbm [resolvable:$true] %s1359_s14 }
  0x18   :  { %v1745_v41 = vsel %vm1695_vm2, %v1375_v35, %v134_v36  ;;  %v142_v42 = vrot.slane %v108_v16, 5  ;;  %149 = vst [vmem:[#allocation1 + $0x10] ss:$2 sm:$0xff] %v1726_v33  ;;  %vm164_vm3 = vcmask 23552   ;;  %vm264_vm4 = vcmask 1041408   ;;  %1427 = vmatpush.msk.msrb.mxu3 %vm109_vm0, %v651_v47 }
  0x19   :  { %v1752_v43 = vsel %vm1695_vm2, %v1376_v38, %v138_v39  ;;  %151 = vst [vmem:[#allocation1 + $0x11] ss:$2 sm:$0xff] %v1730_v34  ;;  %vm265_vm5 = vcmask 1045508   ;;  %v1388_v49 = vrot.slane %v1649_v0, 10  ;;  %v269_v50 = vrot.slane %v101_v8, 6 }
  0x1a   :  { %v1757_v44 = vsel %vm1695_vm2, %v1377_v40, %v142_v42  ;;  %153 = vst [vmem:[#allocation1 + $0x20] ss:$2 sm:$0xff] %v131_v37  ;;  %v1389_v51 = vrot.slane %v1654_v1, 10  ;;  %v273_v52 = vrot.slane %v102_v9, 6  ;;  %vm1776_vm6 = vmor %vm264_vm4, %vm265_vm5  ;;  %v1390_v55 = vrot.slane %v1659_v2, 10 }
  0x1b   :  { %155 = vst [vmem:[#allocation1 + $0x21] ss:$2 sm:$0xff] %v1745_v41  ;;  %v277_v56 = vrot.slane %v103_v10, 6  ;;  %v1391_v57 = vrot.slane %v1664_v3, 10  ;;  %v281_v58 = vrot.slane %v104_v11, 6  ;;  %v1392_v59 = vrot.slane %v1669_v4, 10 }
  0x1c   :  { %157 = vst [vmem:[#allocation1 + $0x30] ss:$2 sm:$0xff] %v1752_v43  ;;  %v285_v61 = vrot.slane %v105_v13, 6  ;;  %v270_v62 = vsel %vm1776_vm6, %v1388_v49, %v269_v50  ;;  %v723_v63 = vld [vmem:[#allocation2 + $0x18] sm:$0x7]  ;;  %v1796_v8 = vsel %vm1776_vm6, %v1389_v51, %v273_v52  ;;  %v289_v9 = vrot.slane %v106_v14, 6 }
  0x1d   :  { %159 = vst [vmem:[#allocation1 + $0x31] ss:$2 sm:$0xff] %v1757_v44  ;;  %v1806_v11 = vsel %vm1776_vm6, %v1390_v55, %v277_v56  ;;  %v1394_v12 = vrot.slane %v1679_v6, 10  ;;  %v293_v13 = vrot.slane %v107_v15, 6  ;;  %v1814_v18 = vsel %vm1776_vm6, %v1391_v57, %v281_v58  ;;  %v575_v15 = vld [vmem:[#allocation2 + $0x12] sm:$0x7] }
  0x1e   :  { %v160_v46 = vld.sshfl [vmem:[#allocation1] sm:$0xff pattern:$0x75316420]  ;;  %v1395_v14 = vrot.slane %v1684_v7, 10  ;;  %v297_v19 = vrot.slane %v108_v16, 6  ;;  %v286_v21 = vsel %vm1776_vm6, %v1392_v59, %v285_v61  ;;  %vm828_vm7 = vcmask 1040384  }
  0x1f   :  { %205 = vst [vmem:[#allocation1] ss:$2 sm:$0xff] %v1649_v0  ;;  %1379 = vmatmul.msk.f32.vlgmr.msra.gmra.mxu0 %vm164_vm3, %v160_v46  ;;  %v511_v0 = vld [vmem:[#allocation2 + $0xf] sm:$0x7]  ;;  %v1831_v24 = vsel %vm1776_vm6, %v1394_v12, %v293_v13  ;;  %v1846_v26 = vld [vmem:[%s2172_s0 + $0x20] sm:$0x3f] }
  0x20   :  { %v161_v48 = vld.sshfl [vmem:[#allocation1 + $0x10] sm:$0xff pattern:$0x75316420]  ;;  %207 = vst [vmem:[#allocation1 + $0x1] ss:$2 sm:$0xff] %v1654_v1  ;;  %1434 = vmatpush.msk.msra.mxu0 %vm109_vm0, %v723_v63  ;;  %1415 = vmatpush.msk.msrb.mxu1 %vm109_vm0, %v511_v0  ;;  %v1836_v16 = vsel %vm1776_vm6, %v1395_v14, %v297_v19  ;;  %v429_v28 = vrot.slane %v1846_v26, 4 }
  0x21   :  { %209 = vst [vmem:[#allocation1 + $0x10] ss:$2 sm:$0xff] %v1659_v2  ;;  %v1406_v32 = vrot.slane %v1846_v26, 9  ;;  %v1413_v46 = vrot.slane %v1846_v26, 10  ;;  %v85_v58 = vld [vmem:[%s2172_s0 + $0x28] sm:$0x3f] }
  0x22   :  { %v162_v53 = vld.sshfl [vmem:[#allocation1 + $0x20] sm:$0xff pattern:$0x75316420]  ;;  %211 = vst [vmem:[#allocation1 + $0x11] ss:$2 sm:$0xff] %v1664_v3  ;;  %v433_v35 = vrot.slane %v429_v28, 5 }
  0x23   :  { %213 = vst [vmem:[#allocation1 + $0x20] ss:$2 sm:$0xff] %v1669_v4  ;;  %v1393_v4 = vrot.slane %v1674_v5, 10  ;;  %v505_v47 = vrot.slane %v429_v28, 6  ;;  %v641_v59 = vrot.slane %v85_v58, 4  ;;  %v1425_v63 = vrot.slane %v85_v58, 9 }
  0x24   :  { %v163_v60 = vld.sshfl [vmem:[#allocation1 + $0x30] sm:$0xff pattern:$0x75316420]  ;;  %215 = vst [vmem:[#allocation1 + $0x21] ss:$2 sm:$0xff] %v1674_v5  ;;  %v1432_v12 = vrot.slane %v85_v58, 10 }
  0x25   :  { %217 = vst [vmem:[#allocation1 + $0x30] ss:$2 sm:$0xff] %v1679_v6  ;;  %v1826_v22 = vsel %vm1776_vm6, %v1393_v4, %v289_v9  ;;  %v1892_v50 = vsel %vm1776_vm6, %v1413_v46, %v505_v47  ;;  %v645_v0 = vrot.slane %v641_v59, 5  ;;  %vm829_vm8 = vcmask 1042434  }
  0x26   :  { %219 = vst [vmem:[#allocation1 + $0x31] ss:$2 sm:$0xff] %v1684_v7  ;;  %vm830_vm9 = vmor %vm828_vm7, %vm829_vm8  ;;  %vm831_vm10 = vcmask 1044484   ;;  %vm816_vm11 = vcmask 1043458   ;;  %vm833_vm13 = vcmask 1046534   ;;  %vm863_vm15 = vcmask 261120  }
  0x27   :  { %v220_v10 = vld.sshfl [vmem:[#allocation1] sm:$0xff pattern:$0x75316420]  ;;  %1380 = vmatmul.msk.f32.gmra.mxu0 %vm164_vm3, %v161_v48  ;;  %vm832_vm12 = vmor %vm830_vm9, %vm831_vm10  ;;  %vm1275_vm1 = vcmask 1041409  }
  0x28   :  { %300 = vst [vmem:[#allocation1] ss:$2 sm:$0xff] %v270_v62  ;;  %1384 = vmatmul.msk.f32.vlgmr.msra.gmra.mxu1 %vm164_vm3, %v220_v10  ;;  %v91_v62 = vld [vmem:[%s2172_s0 + $0x58] sm:$0x3f]  ;;  %vm1984_vm14 = vmor %vm832_vm12, %vm833_vm13 }
  0x29   :  { %v221_v20 = vld.sshfl [vmem:[#allocation1 + $0x10] sm:$0xff pattern:$0x75316420]  ;;  %302 = vst [vmem:[#allocation1 + $0x1] ss:$2 sm:$0xff] %v1796_v8  ;;  %v1433_v17 = vrot.slane %v91_v62, 10 }
  0x2a   :  { %304 = vst [vmem:[#allocation1 + $0x10] ss:$2 sm:$0xff] %v1806_v11 }
  0x2b   :  { %306 = vst [vmem:[#allocation1 + $0x11] ss:$2 sm:$0xff] %v1814_v18  ;;  %v222_v23 = vld.sshfl [vmem:[#allocation1 + $0x20] sm:$0xff pattern:$0x75316420] }
  0x2c   :  { %1386 = vmatmul.msk.f32.vlgmr.msra.gmra.mxu2 %vm164_vm3, %v222_v23  ;;  %308 = vst [vmem:[#allocation1 + $0x20] ss:$2 sm:$0xff] %v286_v21 }
  0x2d   :  { %v223_v25 = vld.sshfl [vmem:[#allocation1 + $0x30] sm:$0xff pattern:$0x75316420]  ;;  %1420 = vmatpush.msk.msra.mxu2 %vm109_vm0, %v575_v15  ;;  %310 = vst [vmem:[#allocation1 + $0x21] ss:$2 sm:$0xff] %v1826_v22  ;;  %vm1238_vm0 = vcmask 1043456  }
  0x2e   :  { %312 = vst [vmem:[#allocation1 + $0x30] ss:$2 sm:$0xff] %v1831_v24 }
  0x2f   :  { %1381 = vmatmul.msk.f32.gmra.mxu0 %vm164_vm3, %v162_v53  ;;  %314 = vst [vmem:[#allocation1 + $0x31] ss:$2 sm:$0xff] %v1836_v16 }
  0x30   :  { %v315_v27 = vld.sshfl [vmem:[#allocation1] sm:$0xff pattern:$0x75316420]  ;;  %1385 = vmatmul.msk.f32.gmra.mxu1 %vm164_vm3, %v221_v20 }
  0x31   :  { %366 = vst [vmem:[#allocation1] ss:$2 sm:$0xff] %v1654_v1  ;;  %v1860_v1 = vld [vmem:[%s2172_s0 + $0x50] sm:$0x3f] }
  0x32   :  { %v316_v30 = vld.sshfl [vmem:[#allocation1 + $0x10] sm:$0xff pattern:$0x75316420]  ;;  %368 = vst [vmem:[#allocation1 + $0x1] ss:$2 sm:$0xff] %v1659_v2  ;;  %v430_v37 = vrot.slane %v1860_v1, 4 }
  0x33   :  { %370 = vst [vmem:[#allocation1 + $0x10] ss:$2 sm:$0xff] %v1664_v3  ;;  %v1407_v39 = vrot.slane %v1860_v1, 9 }
  0x34   :  { %372 = vst [vmem:[#allocation1 + $0x11] ss:$2 sm:$0xff] %v1846_v26  ;;  %1387 = vmatmul.msk.f32.gmra.mxu2 %vm164_vm3, %v223_v25  ;;  %v317_v31 = vld.sshfl [vmem:[#allocation1 + $0x20] sm:$0xff pattern:$0x75316420]  ;;  %v437_v40 = vrot.slane %v430_v37, 5 }
  0x35   :  { %374 = vst [vmem:[#allocation1 + $0x20] ss:$2 sm:$0xff] %v1674_v5  ;;  %v1871_v5 = vsel %vm1695_vm2, %v1406_v32, %v433_v35  ;;  %v509_v51 = vrot.slane %v430_v37, 6 }
  0x36   :  { %376 = vst [vmem:[#allocation1 + $0x21] ss:$2 sm:$0xff] %v1679_v6  ;;  %v1863_v36 = vld.sshfl [vmem:[#allocation1 + $0x30] sm:$0xff pattern:$0x75316420] }
  0x37   :  { %1382 = vmatmul.msk.f32.gmra.mxu0 %vm164_vm3, %v163_v60  ;;  %378 = vst [vmem:[#allocation1 + $0x30] ss:$2 sm:$0xff] %v1684_v7 }
  0x38   :  { %380 = vst [vmem:[#allocation1 + $0x31] ss:$2 sm:$0xff] %v1860_v1 }
  0x39   :  { %v381_v38 = vld.sshfl [vmem:[#allocation1] sm:$0xff pattern:$0x75316420] }
  0x3a   :  { %1402 = vmatmul.msk.f32.vlgmr.msra.gmra.mxu3 %vm164_vm3, %v381_v38  ;;  %440 = vst [vmem:[#allocation1] ss:$2 sm:$0xff] %v1718_v29  ;;  %v1884_v29 = vsel %vm1695_vm2, %v1407_v39, %v437_v40 }
  0x3b   :  { %442 = vst [vmem:[#allocation1 + $0x1] ss:$2 sm:$0xff] %v1726_v33  ;;  %v382_v42 = vld.sshfl [vmem:[#allocation1 + $0x10] sm:$0xff pattern:$0x75316420] }
  0x3c   :  { %1397 = vmatmul.msk.f32.vlgmr.msrb.gmra.mxu2 %vm164_vm3, %v315_v27  ;;  %444 = vst [vmem:[#allocation1 + $0x10] ss:$2 sm:$0xff] %v1730_v34 }
  0x3d   :  { %446 = vst [vmem:[#allocation1 + $0x11] ss:$2 sm:$0xff] %v1871_v5  ;;  %v383_v45 = vld.sshfl [vmem:[#allocation1 + $0x20] sm:$0xff pattern:$0x75316420] }
  0x3e   :  { %448 = vst [vmem:[#allocation1 + $0x20] ss:$2 sm:$0xff] %v1745_v41  ;;  %v1414_v41 = vrot.slane %v1860_v1, 10 }
  0x3f   :  { %450 = vst [vmem:[#allocation1 + $0x21] ss:$2 sm:$0xff] %v1752_v43  ;;  %v384_v48 = vld.sshfl [vmem:[#allocation1 + $0x30] sm:$0xff pattern:$0x75316420] }
  0x40   :  { %452 = vst [vmem:[#allocation1 + $0x30] ss:$2 sm:$0xff] %v1757_v44  ;;  %v1904_v55 = vsel %vm1776_vm6, %v1414_v41, %v509_v51 }
  0x41   :  { %454 = vst [vmem:[#allocation1 + $0x31] ss:$2 sm:$0xff] %v1884_v29 }
  0x42   :  { %1403 = vmatmul.msk.f32.gmra.mxu3 %vm164_vm3, %v382_v42  ;;  %v455_v49 = vld.sshfl [vmem:[#allocation1] sm:$0xff pattern:$0x75316420] }
  0x43   :  { %1409 = vmatmul.msk.f32.vlgmr.msrb.gmra.mxu0 %vm164_vm3, %v455_v49  ;;  %512 = vst [vmem:[#allocation1] ss:$2 sm:$0xff] %v1796_v8 }
  0x44   :  { %1398 = vmatmul.msk.f32.gmra.mxu2 %vm164_vm3, %v316_v30  ;;  %514 = vst [vmem:[#allocation1 + $0x1] ss:$2 sm:$0xff] %v1806_v11  ;;  %v456_v52 = vld.sshfl [vmem:[#allocation1 + $0x10] sm:$0xff pattern:$0x75316420] }
  0x45   :  { %516 = vst [vmem:[#allocation1 + $0x10] ss:$2 sm:$0xff] %v1814_v18 }
  0x46   :  { %518 = vst [vmem:[#allocation1 + $0x11] ss:$2 sm:$0xff] %v1892_v50  ;;  %v457_v53 = vld.sshfl [vmem:[#allocation1 + $0x20] sm:$0xff pattern:$0x75316420] }
  0x47   :  { %520 = vst [vmem:[#allocation1 + $0x20] ss:$2 sm:$0xff] %v1826_v22 }
  0x48   :  { %522 = vst [vmem:[#allocation1 + $0x21] ss:$2 sm:$0xff] %v1831_v24  ;;  %v458_v56 = vld.sshfl [vmem:[#allocation1 + $0x30] sm:$0xff pattern:$0x75316420] }
  0x49   :  { %524 = vst [vmem:[#allocation1 + $0x30] ss:$2 sm:$0xff] %v1836_v16 }
  0x4a   :  { %1404 = vmatmul.msk.f32.gmra.mxu3 %vm164_vm3, %v383_v45  ;;  %526 = vst [vmem:[#allocation1 + $0x31] ss:$2 sm:$0xff] %v1904_v55 }
  0x4b   :  { %v527_v57 = vld.sshfl [vmem:[#allocation1] sm:$0xff pattern:$0x75316420]  ;;  %1410 = vmatmul.msk.f32.gmra.mxu0 %vm164_vm3, %v456_v52 }
  0x4c   :  { %1399 = vmatmul.msk.f32.gmra.mxu2 %vm164_vm3, %v317_v31  ;;  %1416 = vmatmul.msk.f32.vlgmr.msrb.gmra.mxu1 %vm164_vm3, %v527_v57  ;;  %578 = vst [vmem:[#allocation1] ss:$2 sm:$0xff] %v1659_v2  ;;  %v642_v2 = vrot.slane %v91_v62, 4 }
  0x4d   :  { %580 = vst [vmem:[#allocation1 + $0x1] ss:$2 sm:$0xff] %v1664_v3  ;;  %v528_v60 = vld.sshfl [vmem:[#allocation1 + $0x10] sm:$0xff pattern:$0x75316420] }
  0x4e   :  { %582 = vst [vmem:[#allocation1 + $0x10] ss:$2 sm:$0xff] %v1846_v26  ;;  %v649_v4 = vrot.slane %v642_v2, 5 }
  0x4f   :  { %v529_v61 = vld.sshfl [vmem:[#allocation1 + $0x20] sm:$0xff pattern:$0x75316420]  ;;  %584 = vst [vmem:[#allocation1 + $0x11] ss:$2 sm:$0xff] %v85_v58 }
  0x50   :  { %586 = vst [vmem:[#allocation1 + $0x20] ss:$2 sm:$0xff] %v1679_v6  ;;  %v1426_v6 = vrot.slane %v91_v62, 9 }
  0x51   :  { %588 = vst [vmem:[#allocation1 + $0x21] ss:$2 sm:$0xff] %v1684_v7  ;;  %v530_v8 = vld.sshfl [vmem:[#allocation1 + $0x30] sm:$0xff pattern:$0x75316420]  ;;  %v646_v7 = vsel %vm1695_vm2, %v1425_v63, %v645_v0  ;;  %v854_v0 = vld [vmem:[#allocation5 + $0x38] sm:$0xff] }
  0x52   :  { %1405 = vmatmul.msk.f32.gmra.mxu3 %vm164_vm3, %v384_v48  ;;  %590 = vst [vmem:[#allocation1 + $0x30] ss:$2 sm:$0xff] %v1860_v1  ;;  %v650_v13 = vsel %vm1695_vm2, %v1426_v6, %v649_v4  ;;  %878 = vmatpush.msra.mxu1 %v854_v0 }
  0x53   :  { %1411 = vmatmul.msk.f32.gmra.mxu0 %vm164_vm3, %v457_v53  ;;  %592 = vst [vmem:[#allocation1 + $0x31] ss:$2 sm:$0xff] %v91_v62 }
  0x54   :  { %1400 = vmatmul.msk.f32.gmra.mxu2 %vm164_vm3, %v1863_v36  ;;  %1417 = vmatmul.msk.f32.gmra.mxu1 %vm164_vm3, %v528_v60  ;;  %v593_v3 = vld.sshfl [vmem:[#allocation1] sm:$0xff pattern:$0x75316420] }
  0x55   :  { %652 = vst [vmem:[#allocation1] ss:$2 sm:$0xff] %v1726_v33  ;;  %v717_v33 = vrot.slane %v641_v59, 6 }
  0x56   :  { %654 = vst [vmem:[#allocation1 + $0x1] ss:$2 sm:$0xff] %v1730_v34  ;;  %v594_v9 = vld.sshfl [vmem:[#allocation1 + $0x10] sm:$0xff pattern:$0x75316420] }
  0x57   :  { %656 = vst [vmem:[#allocation1 + $0x10] ss:$2 sm:$0xff] %v1871_v5 }
  0x58   :  { %658 = vst [vmem:[#allocation1 + $0x11] ss:$2 sm:$0xff] %v646_v7  ;;  %v595_v10 = vld.sshfl [vmem:[#allocation1 + $0x20] sm:$0xff pattern:$0x75316420] }
  0x59   :  { %660 = vst [vmem:[#allocation1 + $0x20] ss:$2 sm:$0xff] %v1752_v43  ;;  %v721_v43 = vrot.slane %v642_v2, 6 }
  0x5a   :  { %662 = vst [vmem:[#allocation1 + $0x21] ss:$2 sm:$0xff] %v1757_v44  ;;  %v596_v14 = vld.sshfl [vmem:[#allocation1 + $0x30] sm:$0xff pattern:$0x75316420]  ;;  %v718_v44 = vsel %vm1776_vm6, %v1432_v12, %v717_v33 }
  0x5b   :  { %1412 = vmatmul.msk.f32.gmra.mxu0 %vm164_vm3, %v458_v56  ;;  %664 = vst [vmem:[#allocation1 + $0x30] ss:$2 sm:$0xff] %v1884_v29  ;;  %v722_v21 = vsel %vm1776_vm6, %v1433_v17, %v721_v43  ;;  %v851_v17 = vld [vmem:[#allocation5 + $0x20] sm:$0xff] }
  0x5c   :  { %1418 = vmatmul.msk.f32.gmra.mxu1 %vm164_vm3, %v529_v61  ;;  %1421 = vmatmul.msk.f32.vlgmr.msra.gmra.mxu2 %vm164_vm3, %v593_v3  ;;  %666 = vst [vmem:[#allocation1 + $0x31] ss:$2 sm:$0xff] %v650_v13  ;;  %v1970_v61 = vld [vmem:[%s2174_s2] ss:$0 sm:$0xff]  ;;  %v853_v3 = vld [vmem:[#allocation5 + $0x30] sm:$0xff] }
  0x5d   :  { %v667_v34 = vld.sshfl [vmem:[#allocation1] sm:$0xff pattern:$0x75316420]  ;;  %879 = vmatpush.msra.mxu1 %v853_v3 }
  0x5e   :  { %1428 = vmatmul.msk.f32.vlgmr.msrb.gmra.mxu3 %vm164_vm3, %v667_v34  ;;  %724 = vst [vmem:[#allocation1] ss:$2 sm:$0xff] %v1806_v11 }
  0x5f   :  { %726 = vst [vmem:[#allocation1 + $0x1] ss:$2 sm:$0xff] %v1814_v18  ;;  %v668_v19 = vld.sshfl [vmem:[#allocation1 + $0x10] sm:$0xff pattern:$0x75316420] }
  0x60   :  { %728 = vst [vmem:[#allocation1 + $0x10] ss:$2 sm:$0xff] %v1892_v50 }
  0x61   :  { %v669_v20 = vld.sshfl [vmem:[#allocation1 + $0x20] sm:$0xff pattern:$0x75316420]  ;;  %730 = vst [vmem:[#allocation1 + $0x11] ss:$2 sm:$0xff] %v718_v44 }
  0x62   :  { %732 = vst [vmem:[#allocation1 + $0x20] ss:$2 sm:$0xff] %v1831_v24 }
  0x63   :  { %734 = vst [vmem:[#allocation1 + $0x21] ss:$2 sm:$0xff] %v1836_v16  ;;  %v670_v11 = vld.sshfl [vmem:[#allocation1 + $0x30] sm:$0xff pattern:$0x75316420] }
  0x64   :  { %1419 = vmatmul.msk.f32.gmra.mxu1 %vm164_vm3, %v530_v8  ;;  %1422 = vmatmul.msk.f32.gmra.mxu2 %vm164_vm3, %v594_v9  ;;  %736 = vst [vmem:[#allocation1 + $0x30] ss:$2 sm:$0xff] %v1904_v55 }
  0x65   :  { %738 = vst [vmem:[#allocation1 + $0x31] ss:$2 sm:$0xff] %v722_v21 }
  0x66   :  { %1429 = vmatmul.msk.f32.gmra.mxu3 %vm164_vm3, %v668_v19  ;;  %v739_v18 = vld.sshfl [vmem:[#allocation1] sm:$0xff pattern:$0x75316420] }
  0x67   :  { %1435 = vmatmul.msk.f32.vlgmr.msra.gmra.mxu0 %vm164_vm3, %v739_v18 }
  0x68   :  { %v740_v15 = vld.sshfl [vmem:[#allocation1 + $0x10] sm:$0xff pattern:$0x75316420] }
  0x6a   :  { %v741_v54 = vld.sshfl [vmem:[#allocation1 + $0x20] sm:$0xff pattern:$0x75316420] }
  0x6c   :  { %1423 = vmatmul.msk.f32.gmra.mxu2 %vm164_vm3, %v595_v10  ;;  %v742_v22 = vld.sshfl [vmem:[#allocation1 + $0x30] sm:$0xff pattern:$0x75316420] }
  0x6d   :  { %v852_v10 = vld [vmem:[#allocation5 + $0x28] sm:$0xff] }
  0x6e   :  { %1430 = vmatmul.msk.f32.gmra.mxu3 %vm164_vm3, %v669_v20  ;;  %880 = vmatpush.msra.mxu1 %v852_v10 }
  0x6f   :  { %1436 = vmatmul.msk.f32.gmra.mxu0 %vm164_vm3, %v740_v15 }
  0x70   :  { %881 = vmatpush.msra.mxu1 %v851_v17 }
  0x74   :  { %1424 = vmatmul.msk.f32.gmra.mxu2 %vm164_vm3, %v596_v14 }
  0x76   :  { %1431 = vmatmul.msk.f32.gmra.mxu3 %vm164_vm3, %v670_v11 }
  0x77   :  { %1437 = vmatmul.msk.f32.gmra.mxu0 %vm164_vm3, %v741_v54  ;;  %v964_v54 = vld [vmem:[#allocation5 + $0x68] sm:$0xff] }
  0x7f   :  { %1438 = vmatmul.msk.f32.gmra.mxu0 %vm164_vm3, %v742_v22 }
  0x9c   :  { %v193_v23 = vpop.f32.mrf.mxu0 }
  0xa4   :  { %v196_v24 = vpop.f32.mrf.mxu0 }
  0xa5   :  { %v252_v16 = vpop.f32.mrf.mxu1 }
  0xa6   :  { %v253_v29 = vadd.f32 %v252_v16, %v193_v23 }
  0xac   :  { %v199_v26 = vpop.f32.mrf.mxu0 }
  0xad   :  { %v255_v25 = vpop.f32.mrf.mxu1 }
  0xae   :  { %v256_v27 = vadd.f32 %v255_v25, %v196_v24 }
  0xaf   :  { %v258_v28 = vpop.f32.mrf.mxu2 }
  0xb0   :  { %v259_v59 = vadd.f32 %v258_v28, %v199_v26 }
  0xb4   :  { %v202_v31 = vpop.f32.mrf.mxu0 }
  0xb7   :  { %v261_v30 = vpop.f32.mrf.mxu2 }
  0xb8   :  { %v262_v12 = vadd.f32 %v261_v30, %v202_v31 }
  0xbd   :  { %v413_v32 = vpop.f32.mrf.mxu3 }
  0xbf   :  { %v347_v35 = vpop.f32.mrf.mxu2 }
  0xc0   :  { %v487_v1 = vpop.f32.mrf.mxu0  ;;  %v359_v47 = vadd.f32 %v347_v35, %v253_v29 }
  0xc2   :  { %v425_v41 = vadd.f32 %v413_v32, %v359_v47 }
  0xc4   :  { %v499_v52 = vadd.f32 %v487_v1, %v425_v41 }
  0xc5   :  { %v416_v36 = vpop.f32.mrf.mxu3 }
  0xc7   :  { %v350_v37 = vpop.f32.mrf.mxu2 }
  0xc8   :  { %v360_v38 = vadd.f32 %v350_v37, %v256_v27  ;;  %v490_v5 = vpop.f32.mrf.mxu0 }
  0xc9   :  { %v559_v48 = vpop.f32.mrf.mxu1 }
  0xca   :  { %v426_v39 = vadd.f32 %v416_v36, %v360_v38  ;;  %v571_v53 = vadd.f32 %v559_v48, %v499_v52  ;;  %v810_v36 = vld [vmem:[#allocation5 + $0x18] sm:$0xff] }
  0xcb   :  { %908 = vmatpush.msrb.mxu2 %v810_v36 }
  0xcc   :  { %v500_v40 = vadd.f32 %v490_v5, %v426_v39  ;;  %v809_v5 = vld [vmem:[#allocation5 + $0x10] sm:$0xff] }
  0xcd   :  { %v419_v42 = vpop.f32.mrf.mxu3  ;;  %909 = vmatpush.msrb.mxu2 %v809_v5 }
  0xcf   :  { %v353_v45 = vpop.f32.mrf.mxu2 }
  0xd0   :  { %v493_v46 = vpop.f32.mrf.mxu0  ;;  %v361_v62 = vadd.f32 %v353_v45, %v259_v59 }
  0xd1   :  { %v562_v55 = vpop.f32.mrf.mxu1 }
  0xd2   :  { %v572_v2 = vadd.f32 %v562_v55, %v500_v40  ;;  %v427_v7 = vadd.f32 %v419_v42, %v361_v62  ;;  %v808_v42 = vld [vmem:[#allocation5 + $0x8] sm:$0xff] }
  0xd3   :  { %910 = vmatpush.msrb.mxu2 %v808_v42 }
  0xd4   :  { %v501_v20 = vadd.f32 %v493_v46, %v427_v7 }
  0xd5   :  { %v422_v50 = vpop.f32.mrf.mxu3 }
  0xd7   :  { %v356_v49 = vpop.f32.mrf.mxu2 }
  0xd8   :  { %v1965_v51 = vpop.f32.mrf.mxu0  ;;  %v362_v43 = vadd.f32 %v356_v49, %v262_v12  ;;  %v807_v49 = vld [vmem:[#allocation5] sm:$0xff] }
  0xd9   :  { %v565_v13 = vpop.f32.mrf.mxu1  ;;  %911 = vmatpush.msrb.mxu2 %v807_v49 }
  0xda   :  { %v573_v23 = vadd.f32 %v565_v13, %v501_v20  ;;  %v428_v25 = vadd.f32 %v422_v50, %v362_v43 }
  0xdc   :  { %v502_v47 = vadd.f32 %v1965_v51, %v428_v25 }
  0xdf   :  { %v625_v56 = vpop.f32.mrf.mxu2 }
  0xe0   :  { %v637_v57 = vadd.f32 %v625_v56, %v571_v53 }
  0xe1   :  { %v699_v58 = vpop.f32.mrf.mxu3  ;;  %v568_v45 = vpop.f32.mrf.mxu1 }
  0xe2   :  { %v711_v60 = vadd.f32 %v699_v58, %v637_v57  ;;  %v574_v55 = vadd.f32 %v568_v45, %v502_v47 }
  0xe4   :  { %v771_v63 = vpop.f32.mrf.mxu0 }
  0xe5   :  { %v783_v8 = vadd.f32 %v771_v63, %v711_v60 }
  0xe7   :  { %v791_v6 = vadd.f32 %v1970_v61, %v783_v8  ;;  %v628_v4 = vpop.f32.mrf.mxu2 }
  0xe8   :  { %v638_v9 = vadd.f32 %v628_v4, %v572_v2 }
  0xe9   :  { %v1973_v33 = vmax.f32 %v791_v6, 0.0  ;;  %v702_v14 = vpop.f32.mrf.mxu3 }
  0xea   :  { %v712_v34 = vadd.f32 %v702_v14, %v638_v9 }
  0xeb   :  { %v1976_v44 = vrot.slane %v1973_v33, 4  ;;  %v811_v19 = vrot.slane %v1973_v33, 2 }
  0xec   :  { %v774_v21 = vpop.f32.mrf.mxu0 }
  0xed   :  { %v812_v11 = vrot.slane %v1976_v44, 2  ;;  %v815_v18 = vsel %vm264_vm4, %v1973_v33, %v811_v19  ;;  %v817_v15 = vsel %vm816_vm11, %v1973_v33, %v811_v19  ;;  %v784_v22 = vadd.f32 %v774_v21, %v712_v34 }
  0xee   :  { %v1439_v24 = vrot.slane %v815_v18, 9  ;;  %v1440_v16 = vrot.slane %v817_v15, 9 }
  0xef   :  { %v819_v26 = vsel %vm264_vm4, %v1976_v44, %v812_v11  ;;  %v820_v27 = vsel %vm816_vm11, %v1976_v44, %v812_v11  ;;  %v792_v28 = vadd.f32 %v1970_v61, %v784_v22  ;;  %v631_v30 = vpop.f32.mrf.mxu2  ;;  %v931_v22 = vld [vmem:[#allocation5 + $0x58] sm:$0xff] }
  0xf0   :  { %v838_v31 = vsel %vm1984_vm14, %v1439_v24, %v1440_v16  ;;  %v1441_v32 = vrot.slane %v819_v26, 9  ;;  %v1442_v35 = vrot.slane %v820_v27, 9  ;;  %v639_v1 = vadd.f32 %v631_v30, %v573_v23  ;;  %v930_v23 = vld [vmem:[#allocation5 + $0x50] sm:$0xff]  ;;  %954 = vmatpush.msra.mxu3 %v931_v22  ;;  %v929_v26 = vld [vmem:[#allocation5 + $0x48] sm:$0xff]  ;;  %v928_v30 = vld [vmem:[#allocation5 + $0x40] sm:$0xff] }
  0xf1   :  { %855 = vst [vmem:[#allocation1] ss:$4 sm:$0xff] %v838_v31  ;;  %v1995_v37 = vmax.f32 %v792_v28, 0.0  ;;  %v705_v38 = vpop.f32.mrf.mxu3 }
  0xf2   :  { %v1999_v39 = vsel %vm1984_vm14, %v1441_v32, %v1442_v35  ;;  %v713_v40 = vadd.f32 %v705_v38, %v639_v1  ;;  %955 = vmatpush.msra.mxu3 %v930_v23 }
  0xf3   :  { %857 = vst [vmem:[#allocation1 + $0x1] ss:$4 sm:$0xff] %v1999_v39  ;;  %v2003_v46 = vrot.slane %v1995_v37, 4  ;;  %v998_v29 = vrot.slane %v1995_v37, 2 }
  0xf4   :  { %v777_v48 = vpop.f32.mrf.mxu0  ;;  %956 = vmatpush.msra.mxu3 %v929_v26  ;;  %v1263_v26 = vld [vmem:[%s2177_s5 + $0x50] sm:$0xff] }
  0xf5   :  { %v1000_v50 = vsel %vm264_vm4, %v1995_v37, %v998_v29  ;;  %v1001_v41 = vsel %vm816_vm11, %v1995_v37, %v998_v29  ;;  %v1131_v52 = vrot.slane %v2003_v46, 2  ;;  %v785_v53 = vadd.f32 %v777_v48, %v713_v40 }
  0xf6   :  { %v1451_v56 = vrot.slane %v1000_v50, 9  ;;  %v1452_v57 = vrot.slane %v1001_v41, 9  ;;  %957 = vmatpush.msra.mxu3 %v928_v30  ;;  %v966_v50 = vld [vmem:[#allocation5 + $0x78] sm:$0xff]  ;;  %v965_v41 = vld [vmem:[#allocation5 + $0x70] sm:$0xff]  ;;  %v1259_v30 = vld [vmem:[%s2177_s5 + $0x30] sm:$0xff] }
  0xf7   :  { %v1133_v58 = vsel %vm264_vm4, %v2003_v46, %v1131_v52  ;;  %v1134_v51 = vsel %vm816_vm11, %v2003_v46, %v1131_v52  ;;  %v793_v59 = vadd.f32 %v1970_v61, %v785_v53  ;;  %v634_v60 = vpop.f32.mrf.mxu2  ;;  %989 = vmatpush.msrb.mxu1 %v966_v50  ;;  %v963_v52 = vld [vmem:[#allocation5 + $0x60] sm:$0xff] }
  0xf8   :  { %v1458_v62 = vrot.slane %v1133_v58, 9  ;;  %v1459_v63 = vrot.slane %v1134_v51, 9  ;;  %v640_v0 = vadd.f32 %v634_v60, %v574_v55  ;;  %v2019_v8 = vsel %vm1984_vm14, %v1451_v56, %v1452_v57  ;;  %v1017_v55 = vld [vmem:[#allocation5 + $0x98] sm:$0xff]  ;;  %v1016_v56 = vld [vmem:[#allocation5 + $0x90] sm:$0xff]  ;;  %v1015_v57 = vld [vmem:[#allocation5 + $0x88] sm:$0xff] }
  0xf9   :  { %v797_v2 = vmax.f32 %v793_v59, 0.0  ;;  %v708_v3 = vpop.f32.mrf.mxu3  ;;  %990 = vmatpush.msrb.mxu1 %v965_v41  ;;  %1040 = vmatpush.msra.mxu2 %v1017_v55  ;;  %v1014_v58 = vld [vmem:[#allocation5 + $0x80] sm:$0xff]  ;;  %v1312_v55 = vld [vmem:[#allocation7 + $0x68] sm:$0xff] }
  0xfa   :  { %v714_v6 = vadd.f32 %v708_v3, %v640_v0  ;;  %v2023_v4 = vsel %vm1984_vm14, %v1458_v62, %v1459_v63  ;;  %v1063_v62 = vld [vmem:[#allocation5 + $0xb0] sm:$0xff]  ;;  %v1062_v63 = vld [vmem:[#allocation5 + $0xa8] sm:$0xff]  ;;  %v1061_v0 = vld [vmem:[#allocation5 + $0xa0] sm:$0xff] }
  0xfb   :  { %v2025_v7 = vrot.slane %v797_v2, 4  ;;  %v813_v9 = vrot.slane %v797_v2, 2  ;;  %922 = vst.sshfl [vmem:[#allocation1 + $0x20] sm:$0xff pattern:$0x75643120] %v797_v2  ;;  %991 = vmatpush.msrb.mxu1 %v964_v54  ;;  %1041 = vmatpush.msra.mxu2 %v1016_v56  ;;  %v1099_v3 = vld [vmem:[#allocation5 + $0xd8] sm:$0xff] }
  0xfc   :  { %v780_v10 = vpop.f32.mrf.mxu0  ;;  %v1314_v54 = vld [vmem:[#allocation7 + $0x78] sm:$0xff] }
  0xfd   :  { %v814_v12 = vrot.slane %v2025_v7, 2  ;;  %v822_v13 = vsel %vm264_vm4, %v797_v2, %v813_v9  ;;  %v823_v14 = vsel %vm816_vm11, %v797_v2, %v813_v9  ;;  %925 = vst.sshfl [vmem:[#allocation1 + $0x30] sm:$0xff pattern:$0x75643120] %v2025_v7  ;;  %v786_v34 = vadd.f32 %v780_v10, %v714_v6  ;;  %992 = vmatpush.msrb.mxu1 %v963_v52  ;;  %v1098_v6 = vld [vmem:[#allocation5 + $0xd0] sm:$0xff]  ;;  %v1096_v9 = vld [vmem:[#allocation5 + $0xc0] sm:$0xff] }
  0xfe   :  { %v1443_v17 = vrot.slane %v822_v13, 9  ;;  %v1444_v43 = vrot.slane %v823_v14, 9  ;;  %1042 = vmatpush.msra.mxu2 %v1015_v57  ;;  %v1148_v13 = vld [vmem:[#allocation5 + $0xe8] sm:$0xff]  ;;  %v1147_v14 = vld [vmem:[#allocation5 + $0xe0] sm:$0xff]  ;;  %v1313_v52 = vld [vmem:[#allocation7 + $0x70] sm:$0xff] }
  0xff   :  { %v825_v19 = vsel %vm264_vm4, %v2025_v7, %v814_v12  ;;  %v826_v20 = vsel %vm816_vm11, %v2025_v7, %v814_v12  ;;  %v794_v21 = vadd.f32 %v1970_v61, %v786_v34  ;;  %v1149_v12 = vld [vmem:[#allocation5 + $0xf0] sm:$0xff]  ;;  %v1311_v57 = vld [vmem:[#allocation7 + $0x60] sm:$0xff] }
 0x100   :  { %v846_v11 = vsel %vm1984_vm14, %v1443_v17, %v1444_v43  ;;  %v1445_v18 = vrot.slane %v825_v19, 9  ;;  %v1446_v15 = vrot.slane %v826_v20, 9  ;;  %1043 = vmatpush.msra.mxu2 %v1014_v58  ;;  %v1197_v43 = vld [vmem:[#allocation5 + $0x118] sm:$0xff]  ;;  %v1196_v19 = vld [vmem:[#allocation5 + $0x110] sm:$0xff]  ;;  %v1194_v20 = vld [vmem:[#allocation5 + $0x100] sm:$0xff] }
 0x101   :  { %859 = vst [vmem:[#allocation1 + $0x2] ss:$4 sm:$0xff] %v846_v11  ;;  %v2038_v24 = vmax.f32 %v794_v21, 0.0 }
 0x102   :  { %v2042_v16 = vsel %vm1984_vm14, %v1445_v18, %v1446_v15  ;;  %v924_v25 = vld [vmem:[#allocation1 + $0x21] ss:$2 sm:$0xff] }
 0x103   :  { %861 = vst [vmem:[#allocation1 + $0x3] ss:$4 sm:$0xff] %v2042_v16  ;;  %v2046_v61 = vrot.slane %v2038_v24, 4  ;;  %v999_v27 = vrot.slane %v2038_v24, 2 }
 0x104   :  { %v927_v28 = vld [vmem:[#allocation1 + $0x31] ss:$2 sm:$0xff]  ;;  %1055 = vst.sshfl [vmem:[#allocation1 + $0x20] sm:$0xff pattern:$0x75643120] %v2025_v7 }
 0x105   :  { %v1003_v31 = vsel %vm264_vm4, %v2038_v24, %v999_v27  ;;  %v1004_v32 = vsel %vm816_vm11, %v2038_v24, %v999_v27  ;;  %1058 = vst.sshfl [vmem:[#allocation1 + $0x30] sm:$0xff pattern:$0x75643120] %v2038_v24  ;;  %v1132_v35 = vrot.slane %v2046_v61, 2  ;;  %v1261_v27 = vld [vmem:[%s2177_s5 + $0x40] sm:$0xff] }
 0x106   :  { %v1453_v1 = vrot.slane %v1003_v31, 9  ;;  %v1454_v36 = vrot.slane %v1004_v32, 9  ;;  %v1258_v32 = vld [vmem:[%s2177_s5 + $0x28] sm:$0xff] }
 0x107   :  { %v1136_v38 = vsel %vm264_vm4, %v2046_v61, %v1132_v35  ;;  %v1137_v5 = vsel %vm816_vm11, %v2046_v61, %v1132_v35 }
 0x108   :  { %v1460_v40 = vrot.slane %v1136_v38, 9  ;;  %v1461_v42 = vrot.slane %v1137_v5, 9  ;;  %v2062_v45 = vsel %vm1984_vm14, %v1453_v1, %v1454_v36  ;;  %v1257_v1 = vld [vmem:[%s2177_s5 + $0x20] sm:$0xff]  ;;  %v1256_v38 = vld [vmem:[%s2177_s5 + $0x18] sm:$0xff] }
 0x10a   :  { %v862_v29 = vld.sshfl [vmem:[#allocation1] sm:$0xff pattern:$0x73625140]  ;;  %v2066_v47 = vsel %vm1984_vm14, %v1460_v40, %v1461_v42  ;;  %v1255_v40 = vld [vmem:[%s2177_s5 + $0x10] sm:$0xff] }
 0x10b   :  { %v2068_v48 = vld [vmem:[#allocation1 + $0x21] ss:$2 sm:$0xff]  ;;  %1447 = vmatmul.msk.f32.vlgmr.msra.gmra.mxu1 %vm863_vm15, %v862_v29  ;;  %886 = vst [vmem:[#allocation1] ss:$4 sm:$0xff] %v1973_v33 }
 0x10c   :  { %v2072_v49 = vld [vmem:[#allocation1 + $0x31] ss:$2 sm:$0xff]  ;;  %1188 = vst.sshfl [vmem:[#allocation1 + $0x20] sm:$0xff pattern:$0x75643120] %v2038_v24  ;;  %1122 = vmatpush.msra.mxu1 %v1099_v3 }
 0x10d   :  { %1191 = vst.sshfl [vmem:[#allocation1 + $0x30] sm:$0xff pattern:$0x75643120] %v2046_v61 }
 0x10e   :  { %888 = vst [vmem:[#allocation1 + $0x1] ss:$4 sm:$0xff] %v1976_v44  ;;  %1123 = vmatpush.msra.mxu1 %v1098_v6  ;;  %v1307_v6 = vld [vmem:[#allocation7 + $0x40] sm:$0xff] }
 0x10f   :  { %890 = vst [vmem:[#allocation1 + $0x2] ss:$4 sm:$0xff] %v797_v2 }
 0x110   :  { %892 = vst [vmem:[#allocation1 + $0x3] ss:$4 sm:$0xff] %v2025_v7 }
 0x111   :  { %919 = vst.sshfl [vmem:[#allocation1 + $0x10] sm:$0xff pattern:$0x75643120] %v1976_v44 }
 0x113   :  { %v1190_v15 = vld [vmem:[#allocation1 + $0x21] ss:$2 sm:$0xff] }
 0x117   :  { %v893_v53 = vld.sshfl [vmem:[#allocation1] sm:$0xff pattern:$0x73625140] }
 0x118   :  { %1448 = vmatmul.msk.f32.vlgmr.msrb.gmra.mxu2 %vm863_vm15, %v893_v53  ;;  %916 = vst.sshfl [vmem:[#allocation1] sm:$0xff pattern:$0x75643120] %v1973_v33  ;;  %v921_v59 = vld [vmem:[#allocation1 + $0x11] ss:$2 sm:$0xff]  ;;  %v1064_v33 = vld [vmem:[#allocation5 + $0xb8] sm:$0xff] }
 0x119   :  { %936 = vst [vmem:[#allocation1 + $0x2] ss:$4 sm:$0xff] %v924_v25  ;;  %1087 = vmatpush.msrb.mxu3 %v1064_v33  ;;  %v1264_v25 = vld [vmem:[%s2177_s5 + $0x58] sm:$0xff]  ;;  %v1472_v33 = vld [vmem:[%s2176_s4] ss:$0 sm:$0xff] }
 0x11b   :  { %1088 = vmatpush.msrb.mxu3 %v1063_v62  ;;  %v1309_v62 = vld [vmem:[#allocation7 + $0x50] sm:$0xff] }
 0x11d   :  { %1089 = vmatpush.msrb.mxu3 %v1062_v63 }
 0x11f   :  { %v918_v51 = vld [vmem:[#allocation1 + $0x1] ss:$2 sm:$0xff]  ;;  %1090 = vmatpush.msrb.mxu3 %v1061_v0 }
 0x120   :  { %932 = vst [vmem:[#allocation1] ss:$4 sm:$0xff] %v918_v51 }
 0x121   :  { %934 = vst [vmem:[#allocation1 + $0x1] ss:$4 sm:$0xff] %v921_v59  ;;  %v1310_v59 = vld [vmem:[#allocation7 + $0x58] sm:$0xff] }
 0x122   :  { %938 = vst [vmem:[#allocation1 + $0x3] ss:$4 sm:$0xff] %v927_v28  ;;  %v1260_v28 = vld [vmem:[%s2177_s5 + $0x38] sm:$0xff] }
 0x129   :  { %v939_v60 = vld.sshfl [vmem:[#allocation1] sm:$0xff pattern:$0x73625140] }
 0x12a   :  { %1449 = vmatmul.msk.f32.vlgmr.msra.gmra.mxu3 %vm863_vm15, %v939_v60  ;;  %967 = vst [vmem:[#allocation1] ss:$4 sm:$0xff] %v1976_v44 }
 0x12b   :  { %969 = vst [vmem:[#allocation1 + $0x1] ss:$4 sm:$0xff] %v1995_v37  ;;  %1220 = vmatpush.msra.mxu3 %v1197_v43 }
 0x12c   :  { %971 = vst [vmem:[#allocation1 + $0x2] ss:$4 sm:$0xff] %v2025_v7  ;;  %v1097_v7 = vld [vmem:[#allocation5 + $0xc8] sm:$0xff] }
 0x12d   :  { %973 = vst [vmem:[#allocation1 + $0x3] ss:$4 sm:$0xff] %v2038_v24  ;;  %1124 = vmatpush.msra.mxu1 %v1097_v7  ;;  %1221 = vmatpush.msra.mxu3 %v1196_v19  ;;  %v1303_v19 = vld [vmem:[#allocation7 + $0x20] sm:$0xff] }
 0x12f   :  { %1125 = vmatpush.msra.mxu1 %v1096_v9  ;;  %v1306_v9 = vld [vmem:[#allocation7 + $0x38] sm:$0xff] }
 0x134   :  { %v974_v2 = vld.sshfl [vmem:[#allocation1] sm:$0xff pattern:$0x73625140] }
 0x135   :  { %1450 = vmatmul.msk.f32.vlgmr.msrb.gmra.mxu1 %vm863_vm15, %v974_v2  ;;  %1018 = vst [vmem:[#allocation1] ss:$4 sm:$0xff] %v1999_v39  ;;  %v1150_v39 = vld [vmem:[#allocation5 + $0xf8] sm:$0xff]  ;;  %v1308_v2 = vld [vmem:[#allocation7 + $0x48] sm:$0xff] }
 0x136   :  { %1020 = vst [vmem:[#allocation1 + $0x1] ss:$4 sm:$0xff] %v2019_v8  ;;  %1173 = vmatpush.msrb.mxu2 %v1150_v39  ;;  %1319 = vmatpush.msrb.mxu1 %v1314_v54 }
 0x137   :  { %1022 = vst [vmem:[#allocation1 + $0x2] ss:$4 sm:$0xff] %v2042_v16  ;;  %v1265_v16 = vld [vmem:[%s2177_s5 + $0x60] sm:$0xff] }
 0x138   :  { %1024 = vst [vmem:[#allocation1 + $0x3] ss:$4 sm:$0xff] %v2062_v45  ;;  %1174 = vmatpush.msrb.mxu2 %v1149_v12  ;;  %1320 = vmatpush.msrb.mxu1 %v1313_v52  ;;  %v1305_v12 = vld [vmem:[#allocation7 + $0x30] sm:$0xff] }
 0x139   :  { %1052 = vst.sshfl [vmem:[#allocation1 + $0x10] sm:$0xff pattern:$0x75643120] %v1995_v37 }
 0x13a   :  { %1175 = vmatpush.msrb.mxu2 %v1148_v13  ;;  %1321 = vmatpush.msrb.mxu1 %v1312_v55 }
 0x13c   :  { %1176 = vmatpush.msrb.mxu2 %v1147_v14  ;;  %1322 = vmatpush.msrb.mxu1 %v1311_v57 }
 0x13e   :  { %1323 = vmatpush.msrb.mxu1 %v1310_v59 }
 0x13f   :  { %v1025_v10 = vld.sshfl [vmem:[#allocation1] sm:$0xff pattern:$0x73625140] }
 0x140   :  { %1455 = vmatmul.msk.f32.vlgmr.msra.gmra.mxu2 %vm863_vm15, %v1025_v10  ;;  %1049 = vst.sshfl [vmem:[#allocation1] sm:$0xff pattern:$0x75643120] %v1976_v44  ;;  %v1054_v17 = vld [vmem:[#allocation1 + $0x11] ss:$2 sm:$0xff]  ;;  %1324 = vmatpush.msrb.mxu1 %v1309_v62 }
 0x141   :  { %1069 = vst [vmem:[#allocation1 + $0x2] ss:$4 sm:$0xff] %v2068_v48  ;;  %v1195_v44 = vld [vmem:[#allocation5 + $0x108] sm:$0xff] }
 0x142   :  { %1222 = vmatpush.msra.mxu3 %v1195_v44  ;;  %1325 = vmatpush.msrb.mxu1 %v1308_v2 }
 0x144   :  { %1223 = vmatpush.msra.mxu3 %v1194_v20  ;;  %1326 = vmatpush.msrb.mxu1 %v1307_v6 }
 0x146   :  { %1327 = vmatpush.msrb.mxu1 %v1306_v9 }
 0x147   :  { %v1051_v34 = vld [vmem:[#allocation1 + $0x1] ss:$2 sm:$0xff] }
 0x148   :  { %1065 = vst [vmem:[#allocation1] ss:$4 sm:$0xff] %v1051_v34  ;;  %v1304_v34 = vld [vmem:[#allocation7 + $0x28] sm:$0xff]  ;;  %1328 = vmatpush.msrb.mxu1 %v1305_v12 }
 0x149   :  { %1067 = vst [vmem:[#allocation1 + $0x1] ss:$4 sm:$0xff] %v1054_v17 }
 0x14a   :  { %1071 = vst [vmem:[#allocation1 + $0x3] ss:$4 sm:$0xff] %v2072_v49  ;;  %1329 = vmatpush.msrb.mxu1 %v1304_v34 }
 0x14c   :  { %1330 = vmatpush.msrb.mxu1 %v1303_v19 }
 0x151   :  { %v1072_v21 = vld.sshfl [vmem:[#allocation1] sm:$0xff pattern:$0x73625140] }
 0x152   :  { %1456 = vmatmul.msk.f32.vlgmr.msrb.gmra.mxu3 %vm863_vm15, %v1072_v21  ;;  %1100 = vst [vmem:[#allocation1] ss:$4 sm:$0xff] %v1995_v37  ;;  %v1302_v21 = vld [vmem:[#allocation7 + $0x18] sm:$0xff] }
 0x153   :  { %1102 = vst [vmem:[#allocation1 + $0x1] ss:$4 sm:$0xff] %v2003_v46  ;;  %1331 = vmatpush.msrb.mxu1 %v1302_v21 }
 0x154   :  { %1104 = vst [vmem:[#allocation1 + $0x2] ss:$4 sm:$0xff] %v2038_v24  ;;  %v1193_v24 = vld [vmem:[#allocation1 + $0x31] ss:$2 sm:$0xff] }
 0x155   :  { %1106 = vst [vmem:[#allocation1 + $0x3] ss:$4 sm:$0xff] %v2046_v61  ;;  %v1262_v61 = vld [vmem:[%s2177_s5 + $0x48] sm:$0xff] }
 0x15c   :  { %v1107_v11 = vld.sshfl [vmem:[#allocation1] sm:$0xff pattern:$0x73625140] }
 0x15d   :  { %1457 = vmatmul.msk.f32.vlgmr.msra.gmra.mxu1 %vm863_vm15, %v1107_v11  ;;  %1151 = vst [vmem:[#allocation1] ss:$4 sm:$0xff] %v2019_v8 }
 0x15e   :  { %1153 = vst [vmem:[#allocation1 + $0x1] ss:$4 sm:$0xff] %v2023_v4  ;;  %v1267_v4 = vld [vmem:[%s2177_s5 + $0x70] sm:$0xff] }
 0x15f   :  { %1155 = vst [vmem:[#allocation1 + $0x2] ss:$4 sm:$0xff] %v2062_v45  ;;  %v1254_v45 = vld [vmem:[%s2177_s5 + $0x8] sm:$0xff] }
 0x160   :  { %1157 = vst [vmem:[#allocation1 + $0x3] ss:$4 sm:$0xff] %v2066_v47  ;;  %v1253_v47 = vld [vmem:[%s2177_s5] sm:$0xff] }
 0x161   :  { %1185 = vst.sshfl [vmem:[#allocation1 + $0x10] sm:$0xff pattern:$0x75643120] %v2003_v46  ;;  %v1268_v46 = vld [vmem:[%s2177_s5 + $0x78] sm:$0xff] }
 0x162   :  { %1278 = vmatpush.msrb.mxu0 %v1268_v46 }
 0x164   :  { %1279 = vmatpush.msrb.mxu0 %v1267_v4  ;;  %v1301_v4 = vld [vmem:[#allocation7 + $0x10] sm:$0xff] }
 0x165   :  { %1332 = vmatpush.msrb.mxu1 %v1301_v4 }
 0x167   :  { %v1158_v18 = vld.sshfl [vmem:[#allocation1] sm:$0xff pattern:$0x73625140] }
 0x168   :  { %1462 = vmatmul.msk.f32.vlgmr.msrb.gmra.mxu2 %vm863_vm15, %v1158_v18  ;;  %1182 = vst.sshfl [vmem:[#allocation1] sm:$0xff pattern:$0x75643120] %v1995_v37  ;;  %v1187_v23 = vld [vmem:[#allocation1 + $0x11] ss:$2 sm:$0xff]  ;;  %v1266_v37 = vld [vmem:[%s2177_s5 + $0x68] sm:$0xff] }
 0x169   :  { %1202 = vst [vmem:[#allocation1 + $0x2] ss:$4 sm:$0xff] %v1190_v15  ;;  %1280 = vmatpush.msrb.mxu0 %v1266_v37  ;;  %v1300_v37 = vld [vmem:[#allocation7 + $0x8] sm:$0xff] }
 0x16a   :  { %1333 = vmatpush.msrb.mxu1 %v1300_v37 }
 0x16b   :  { %1281 = vmatpush.msrb.mxu0 %v1265_v16  ;;  %v1299_v16 = vld [vmem:[#allocation7] sm:$0xff] }
 0x16c   :  { %1334 = vmatpush.msrb.mxu1 %v1299_v16 }
 0x16d   :  { %1282 = vmatpush.msrb.mxu0 %v1264_v25  ;;  %v1473_v25 = vld [vmem:[%s2178_s6] ss:$0 sm:$0xff]  ;;  %s1586_s6 = smov [#allocation8]  }
 0x16e   :  { %s1357_s12 = sshll.u32 %s1586_s6, 4  ;;  %s1358_s12 = int_to_ptr.vmem [resolvable:$true] %s1357_s12 }
 0x16f   :  { %v1184_v22 = vld [vmem:[#allocation1 + $0x1] ss:$2 sm:$0xff]  ;;  %1283 = vmatpush.msrb.mxu0 %v1263_v26 }
 0x170   :  { %1198 = vst [vmem:[#allocation1] ss:$4 sm:$0xff] %v1184_v22 }
 0x171   :  { %1200 = vst [vmem:[#allocation1 + $0x1] ss:$4 sm:$0xff] %v1187_v23  ;;  %1284 = vmatpush.msrb.mxu0 %v1262_v61 }
 0x172   :  { %1204 = vst [vmem:[#allocation1 + $0x3] ss:$4 sm:$0xff] %v1193_v24 }
 0x173   :  { %1285 = vmatpush.msrb.mxu0 %v1261_v27 }
 0x175   :  { %1286 = vmatpush.msrb.mxu0 %v1260_v28  ;;  %v1474_v28 = vld [vmem:[%s2180_s8] ss:$0 sm:$0xff] }
 0x177   :  { %1287 = vmatpush.msrb.mxu0 %v1259_v30 }
 0x179   :  { %v1205_v8 = vld.sshfl [vmem:[#allocation1] sm:$0xff pattern:$0x73625140]  ;;  %1288 = vmatpush.msrb.mxu0 %v1258_v32 }
 0x17a   :  { %1463 = vmatmul.msk.f32.vlgmr.msra.gmra.mxu3 %vm863_vm15, %v1205_v8 }
 0x17b   :  { %1289 = vmatpush.msrb.mxu0 %v1257_v1 }
 0x17d   :  { %1290 = vmatpush.msrb.mxu0 %v1256_v38 }
 0x17f   :  { %1291 = vmatpush.msrb.mxu0 %v1255_v40 }
 0x181   :  { %1292 = vmatpush.msrb.mxu0 %v1254_v45 }
 0x183   :  { %1293 = vmatpush.msrb.mxu0 %v1253_v47 }
 0x188   :  { %v883_v31 = vpop.f32.mrf.mxu1 }
 0x19b   :  { %v913_v35 = vpop.f32.mrf.mxu2 }
 0x19c   :  { %v914_v5 = vadd.f32 %v913_v35, %v883_v31 }
 0x1ad   :  { %v959_v36 = vpop.f32.mrf.mxu3 }
 0x1ae   :  { %v962_v42 = vadd.f32 %v959_v36, %v914_v5 }
 0x1b2   :  { %v994_v29 = vpop.f32.mrf.mxu1 }
 0x1b3   :  { %v997_v49 = vadd.f32 %v994_v29, %v962_v42 }
 0x1c3   :  { %v1045_v48 = vpop.f32.mrf.mxu2 }
 0x1c4   :  { %v1048_v41 = vadd.f32 %v1045_v48, %v997_v49 }
 0x1d5   :  { %v1092_v50 = vpop.f32.mrf.mxu3 }
 0x1d6   :  { %v1095_v53 = vadd.f32 %v1092_v50, %v1048_v41 }
 0x1da   :  { %v1127_v56 = vpop.f32.mrf.mxu1 }
 0x1db   :  { %v1130_v51 = vadd.f32 %v1127_v56, %v1095_v53 }
 0x1eb   :  { %v1178_v58 = vpop.f32.mrf.mxu2 }
 0x1ec   :  { %v1181_v60 = vadd.f32 %v1178_v58, %v1130_v51 }
 0x1fd   :  { %v1225_v63 = vpop.f32.mrf.mxu3 }
 0x1fe   :  { %v1228_v0 = vadd.f32 %v1225_v63, %v1181_v60 }
 0x200   :  { %v1233_v3 = vadd.f32 %v1472_v33, %v1228_v0 }
 0x202   :  { %v1234_v7 = vmax.f32 %v1233_v3, 0.0 }
 0x204   :  { %v1236_v10 = vrot.slane %v1234_v7, 4  ;;  %v1239_v39 = vsel %vm1238_vm0, %v1234_v7, -inf }
 0x205   :  { %v1240_v13 = vrot.slane %v1239_v39, 4 }
 0x206   :  { %v1246_v14 = vsel %vm1238_vm0, %v1236_v10, -inf }
 0x207   :  { %v1241_v17 = vmax.f32 %v1239_v39, %v1240_v13  ;;  %v1247_v43 = vrot.slane %v1246_v14, 4 }
 0x209   :  { %v1242_v44 = vrot.slane %v1241_v17, 2  ;;  %v1248_v20 = vmax.f32 %v1246_v14, %v1247_v43 }
 0x20b   :  { %v1243_v11 = vmax.f32 %v1241_v17, %v1242_v44  ;;  %v1249_v18 = vrot.slane %v1248_v20, 2 }
 0x20d   :  { %v1244_v15 = vrot.slane %v1243_v11, 1  ;;  %v1250_v22 = vmax.f32 %v1248_v20, %v1249_v18 }
 0x20f   :  { %v1251_v23 = vrot.slane %v1250_v22, 1  ;;  %v1245_v24 = vmax.f32 %v1243_v11, %v1244_v15 }
 0x211   :  { %v1252_v8 = vmax.f32 %v1250_v22, %v1251_v23 }
 0x213   :  { %v1276_v46 = vsel %vm1275_vm1, %v1252_v8, %v1245_v24 }
 0x214   :  { %1294 = vmatmul.f32.vlgmr.msrb.gmra.mxu0 %v1276_v46 }
 0x291   :  { %v1295_v26 = vpop.f32.mrf.mxu0 }
 0x292   :  { %v1296_v61 = vadd.f32 %v1473_v25, %v1295_v26 }
 0x294   :  { %v1298_v27 = vmax.f32 %v1296_v61, 0.0 }
 0x296   :  { %1335 = vmatmul.f32.vlgmr.msrb.gmra.mxu1 %v1298_v27 }
 0x313   :  { %v1336_v30 = vpop.f32.mrf.mxu1 }
 0x314   :  { %v1337_v31 = vadd.f32 %v1474_v28, %v1336_v30 }
 0x316   :  { %v1339_v32 = vsel %vm264_vm4, %v1337_v31, -inf }
 0x317   :  { %1340 = vmax.xlane.f32.xlu0 %v1339_v32 }
 0x38a   :  { %v1341_v35 = vpop.xlane.xlu0 %1340 }
 0x38b   :  { %v1342_v1 = vsub.f32 %v1337_v31, %v1341_v35 }
 0x38d   :  { %v1343_v36 = vmul.f32 1.442695, %v1342_v1 }
 0x38f   :  { %1475 = vpow2.f32 %v1343_v36 }
 0x395   :  { %v1476_v38 = vpop.eup %1475 }
 0x396   :  { %v1345_v5 = vsel %vm264_vm4, %v1476_v38, 0.0 }
 0x397   :  { %1346 = vadd.xlane.f32.xlu0 %v1345_v5 }
 0x40a   :  { %v1347_v40 = vpop.xlane.xlu0 %1346 }
 0x40b   :  { %1477 = vlog2.f32 %v1347_v40 }
 0x411   :  { %v1478_v42 = vpop.eup %1477 }
 0x412   :  { %v1349_v45 = vmul.f32 0.6931472, %v1478_v42 }
 0x414   :  { %v1350_v29 = vsub.f32 %v1342_v1, %v1349_v45 }
 0x416   :  { %1351 = vst [vmem:[#allocation8] sm:$0x3] %v1350_v29 }
 0x417   :  { %1362 = dma.vmem_to_hbm [thread:$0]  %s1358_s12, 32, %s1360_s14, [#allocation4]  }
 0x418   :  { %1579 = dma.done.wait [#allocation4], 32  }
 0x419   :  { %1580 = vsyncadd [#allocation4], 4294967264 }
 0x41a   :  { %1367 = vsyncpa [#allocation3], 1 }
 0x41b   :  { %1368 = vsyncpa [#allocation6], 1 }
 0x41c   :  { %1369 = vsyncpa [#allocation4], 1 }

</bundles_post_ra>
